<compile_context>
chip_gen: v7x
topology: tpu7x:2x2x1
jax: 0.10.0
libtpu: 0.0.40
codegen_flags: <defaults>
</compile_context>

<pallas_src>
import functools

import numpy as np

import jax
import jax.numpy as jnp
from jax import lax
from jax.lax import linalg as lax_linalg
from jax.experimental import pallas as pl
from jax.experimental.pallas import tpu as pltpu

EMBED_DIM = 16          # embedding_dim
W_SIZE = 32             # w_size  (>= 2 * embedding_dim)
NUM_SAMPLES = 2
W_ITER = 1
EPS = 0.0               # Whitening2d shrinkage eps (module default)
NORMALIZE_EPS = 1e-12   # F.normalize default eps
_MAX_PACK_LANES = 512   # cap on packed lane width per grid step


def _choose_pack(p_total: int, num_samples: int, f: int, w_size: int) -> int:
    """Sub-batches packed per grid step (TB).  Multiple of num_samples, divides ng."""
    sf = num_samples * f
    # Lane cap: <=512 packed lanes and keep the (w_size, TB*f) input block <~2 MiB.
    max_lanes = min(_MAX_PACK_LANES, max(sf, (2 * 1024 * 1024) // (4 * max(w_size, 1))))
    d_max = max(1, max_lanes // sf)
    divs = [d for d in range(1, min(d_max, p_total) + 1) if p_total % d == 0]
    best = divs[-1]
    # Prefer >=128 packed lanes while keeping >=2 grid steps (v7x megacore).
    good = [d for d in divs if d * sf >= 128 and p_total // d >= 2]
    if good:
        best = good[-1]
    return best * num_samples


# ----------------------------------------------------------------------------
# Kernel 1: per-chunk covariances.
# Input  xp  : (1, W, TB*f)  lane-packed sub-batch rows.
# Output cov : (1, f, TB*f)  lane-dense slab; block t holds cov of sub-batch t
#              (shrinkage (1-eps)*cov + eps*I already applied).
# ----------------------------------------------------------------------------
def _cov_kernel(xp_ref, cov_ref, *, f, tb, w, eps):
    x = xp_ref[0]                                                   # (W, TB*f)
    mean = jnp.sum(x, axis=0, keepdims=True) * (1.0 / w)            # (1, TB*f)
    xn = x - mean
    # One wide MXU matmul; the diagonal f x f blocks are the per-sub-batch covs.
    big = lax.dot_general(xn, xn, (((0,), (0,)), ((), ())),
                          preferred_element_type=jnp.float32,
                          precision=lax.Precision.HIGHEST)          # (TB*f, TB*f)
    scale = (1.0 - eps) / (w - 1)
    blocks = [big[t * f:(t + 1) * f, t * f:(t + 1) * f] * scale for t in range(tb)]
    slab = jnp.concatenate(blocks, axis=1)                          # (f, TB*f)
    if eps != 0.0:
        slab = slab + eps * jnp.tile(jnp.eye(f, dtype=jnp.float32), (1, tb))
    cov_ref[0] = slab


# ----------------------------------------------------------------------------
# Kernel 2: whiten (block-diag MXU matmul) + row L2-normalize + pairwise dots.
# Inputs xp  : (1, W, P)   lane-packed sub-batch rows (P = TB*f)
#        wbd : (1, P, P)   block-diagonal inv_sqrt^T weights
#        gm  : (P, P)      0/1 same-segment mask (per sub-batch feature block)
#        hm  : (P, TG*f)   0/1 sample-sum mask (sums samples within a group)
# Output     : (1, 8, 128) per-chunk partial pairwise dot sum (broadcast scalar)
# ----------------------------------------------------------------------------
def _whiten_loss_kernel(xp_ref, wbd_ref, gm_ref, hm_ref, out_ref, *, w, norm_eps):
    x = xp_ref[0]                                                   # (W, P)
    mean = jnp.sum(x, axis=0, keepdims=True) * (1.0 / w)
    xn = x - mean
    # Whitening apply: y_seg = xn_seg @ inv_sqrt^T  -> one wide MXU matmul.
    y = lax.dot_general(xn, wbd_ref[0], (((1,), (0,)), ((), ())),
                        preferred_element_type=jnp.float32,
                        precision=lax.Precision.HIGHEST)            # (W, P)
    # Per-row, per-sub-batch squared norm broadcast to every lane of its segment.
    ss = lax.dot_general(y * y, gm_ref[...], (((1,), (0,)), ((), ())),
                         preferred_element_type=jnp.float32,
                         precision=lax.Precision.HIGHEST)           # (W, P)
    # F.normalize: y / max(||y||, eps) == y * rsqrt(max(||y||^2, eps^2))
    yn = y * lax.rsqrt(jnp.maximum(ss, norm_eps * norm_eps))
    # Sum of samples within each group (per row / feature): z = yn @ H.
    z = lax.dot_general(yn, hm_ref[...], (((1,), (0,)), ((), ())),
                        preferred_element_type=jnp.float32,
                        precision=lax.Precision.HIGHEST)            # (W, TG*f)
    sum_z2 = jnp.sum(jnp.sum(z * z, axis=1, keepdims=True), axis=0, keepdims=True)
    sum_y2 = jnp.sum(jnp.sum(yn * yn, axis=1, keepdims=True), axis=0, keepdims=True)
    # sum_{i<j} <y_i, y_j> = 0.5 * (||sum_s y_s||^2 - sum_s ||y_s||^2)   (exact)
    pair = 0.5 * (sum_z2 - sum_y2)                                  # (1, 1)
    out_ref[0] = jnp.broadcast_to(pair, (8, 128))


# ----------------------------------------------------------------------------
# WMSELoss forward
# ----------------------------------------------------------------------------
@functools.partial(jax.jit,
                   static_argnames=("num_samples", "w_iter", "w_size", "eps"))
def wmse_loss(inputs, key, *, num_samples=NUM_SAMPLES, w_iter=W_ITER,
              w_size=W_SIZE, eps=EPS):
    total, f = inputs.shape
    assert total % num_samples == 0, "input batch size must be divisible by num_samples"
    bs = total // num_samples
    assert bs >= w_size, "batch size must be >= w_size"
    assert bs % w_size == 0, "batch size must be divisible by w_size"
    g = bs // w_size
    num_pairs = num_samples * (num_samples - 1) // 2
    p_total = w_iter * g                          # independent whitening groups
    ng = p_total * num_samples                    # total sub-batches to whiten

    tb = _choose_pack(p_total, num_samples, f, w_size)   # sub-batches per grid step
    n_chunks = ng // tb
    P = tb * f                                    # packed lane width
    tgf = (tb // num_samples) * f                 # groups-per-chunk * f

    # --- permutations + single packed gather (XLA) ---------------------------
    keys = jax.random.split(key, w_iter)
    perms = jax.vmap(lambda k: jax.random.permutation(k, bs))(keys)     # (w_iter, bs)
    perm_grid = perms.reshape(w_iter, g, w_size)
    offs = jnp.arange(num_samples, dtype=perm_grid.dtype) * bs
    idx = perm_grid[:, :, None, :] + offs[None, None, :, None]          # (iter,g,S,W)
    idx = idx.reshape(n_chunks, tb, w_size).transpose(0, 2, 1)          # (NC, W, TB)
    # Gather directly into the lane-packed layout (no big data transpose).
    xp = inputs[idx].reshape(n_chunks, w_size, P)                       # (NC, W, P)

    # --- Pallas kernel 1: lane-packed covariances ----------------------------
    cov_slab = pl.pallas_call(
        functools.partial(_cov_kernel, f=f, tb=tb, w=w_size, eps=eps),
        grid=(n_chunks,),
        in_specs=[pl.BlockSpec((1, w_size, P), lambda i: (i, 0, 0))],
        out_specs=pl.BlockSpec((1, f, P), lambda i: (i, 0, 0)),
        out_shape=jax.ShapeDtypeStruct((n_chunks, f, P), jnp.float32),
        compiler_params=pltpu.CompilerParams(dimension_semantics=("parallel",)),
    )(xp)

    # --- batched 16x16 Cholesky + triangular solve (plain XLA, one op each) --
    # TODO(synk): torch.linalg.cholesky / solve_triangular are small sequential
    # FxF factorizations; fusing them into the Pallas kernel is left as a
    # stretch goal - here they are single batched XLA ops.
    cov = (cov_slab.reshape(n_chunks, f, tb, f)
           .transpose(0, 2, 1, 3).reshape(ng, f, f))
    chol = jnp.linalg.cholesky(cov)
    eye = jnp.eye(f, dtype=jnp.float32)
    inv_sqrt = lax_linalg.triangular_solve(
        chol, jnp.broadcast_to(eye, (ng, f, f)), left_side=True, lower=True)

    # Block-diagonal whitening weights in the packed-lane layout.
    w_t = jnp.swapaxes(inv_sqrt, -1, -2).reshape(n_chunks, tb, f, f)
    eye_tb = jnp.eye(tb, dtype=jnp.float32)
    wbd = (w_t[:, :, :, None, :] * eye_tb[None, :, None, :, None]
           ).reshape(n_chunks, P, P)

    # Static 0/1 masks (compile-time constants).
    lane = np.arange(P)
    g_mat = jnp.asarray((lane[:, None] // f) == (lane[None, :] // f),
                        dtype=jnp.float32)                               # (P, P)
    col = np.arange(tgf)
    h_mat = jnp.asarray(
        ((lane[:, None] // (num_samples * f)) == (col[None, :] // f))
        & ((lane[:, None] % f) == (col[None, :] % f)), dtype=jnp.float32)  # (P, TG*f)

    # --- Pallas kernel 2: whiten + normalize + pairwise dot partials ---------
    partials = pl.pallas_call(
        functools.partial(_whiten_loss_kernel, w=w_size, norm_eps=NORMALIZE_EPS),
        grid=(n_chunks,),
        in_specs=[pl.BlockSpec((1, w_size, P), lambda i: (i, 0, 0)),
                  pl.BlockSpec((1, P, P), lambda i: (i, 0, 0)),
                  pl.BlockSpec((P, P), lambda i: (0, 0)),
                  pl.BlockSpec((P, tgf), lambda i: (0, 0))],
        out_specs=pl.BlockSpec((1, 8, 128), lambda i: (i, 0, 0)),
        out_shape=jax.ShapeDtypeStruct((n_chunks, 8, 128), jnp.float32),
        compiler_params=pltpu.CompilerParams(dimension_semantics=("parallel",)),
    )(xp, wbd, g_mat, h_mat)

    # loss = sum_{iter,pairs} [2 - 2*mean_n(dots)] / (w_iter * num_pairs)
    #      = 2 - 2 * total_dot_sum / (bs * w_iter * num_pairs)
    # TODO(synk): running_mean / running_variance momentum buffer updates from
    # Whitening2d are training-time side effects that do not affect the loss.
    dot_total = jnp.sum(partials[:, 0, 0])
    return 2.0 - 2.0 * dot_total / (bs * w_iter * num_pairs)


# ----------------------------------------------------------------------------
# Pure-JAX reference (mirrors the PyTorch module structure) for validation.
# ----------------------------------------------------------------------------
def _whiten_ref(x, eps):
    f = x.shape[1]
    m = jnp.mean(x, axis=0, keepdims=True)
    xn = x - m
    cov = (xn.T @ xn) / (x.shape[0] - 1)
    cov_s = (1.0 - eps) * cov + eps * jnp.eye(f, dtype=x.dtype)
    chol = jnp.linalg.cholesky(cov_s)
    inv_sqrt = jax.scipy.linalg.solve_triangular(
        chol, jnp.eye(f, dtype=x.dtype), lower=True)
    return xn @ inv_sqrt.T


def _norm_mse_ref(x0, x1):
    x0 = x0 / jnp.maximum(jnp.linalg.norm(x0, axis=1, keepdims=True), NORMALIZE_EPS)
    x1 = x1 / jnp.maximum(jnp.linalg.norm(x1, axis=1, keepdims=True), NORMALIZE_EPS)
    return 2.0 - 2.0 * jnp.mean(jnp.sum(x0 * x1, axis=-1))


def _wmse_loss_reference(inputs, key, *, num_samples, w_iter, w_size, eps):
    total, _ = inputs.shape
    bs = total // num_samples
    g = bs // w_size
    num_pairs = num_samples * (num_samples - 1) // 2
    keys = jax.random.split(key, w_iter)
    perms = jax.vmap(lambda k: jax.random.permutation(k, bs))(keys)
    loss = 0.0
    for it in range(w_iter):
        z = jnp.zeros_like(inputs)
        perm = perms[it].reshape(g, w_size)
        for gi in range(g):
            idx = perm[gi]
            for i in range(num_samples):
                rows = inputs[idx + i * bs]
                z = z.at[idx + i * bs].set(_whiten_ref(rows, eps))
        for i in range(num_samples - 1):
            for j in range(i + 1, num_samples):
                loss = loss + _norm_mse_ref(z[i * bs:(i + 1) * bs],
                                            z[j * bs:(j + 1) * bs])
    return loss / (w_iter * num_pairs)


def _run_case(x, key, *, num_samples, w_iter, w_size, eps, label):
    loss = wmse_loss(x, key, num_samples=num_samples, w_iter=w_iter,
                     w_size=w_size, eps=eps)
    loss = jax.block_until_ready(loss)
    assert loss.shape == () and bool(jnp.isfinite(loss)), label
    with jax.default_matmul_precision("highest"):
        ref = _wmse_loss_reference(x, key, num_samples=num_samples,
                                   w_iter=w_iter, w_size=w_size, eps=eps)
    ref = jax.block_until_ready(ref)
    assert abs(float(loss) - float(ref)) < 2e-3, (label, float(loss), float(ref))
    return float(loss)


if __name__ == "__main__":
    key = jax.random.PRNGKey(0)
    k_data1, k_perm1, k_data2, k_perm2 = jax.random.split(key, 4)

    # Case 1: smallest legal batch (bs == w_size): one group, one chunk.
    bs1 = W_SIZE
    x1 = jax.random.normal(k_data1, (bs1 * NUM_SAMPLES, EMBED_DIM), dtype=jnp.float32)
    _run_case(x1, k_perm1, num_samples=NUM_SAMPLES, w_iter=W_ITER,
              w_size=W_SIZE, eps=EPS, label="small")

    # Case 2: several groups + 2 whitening iterations -> exercises the
    # lane-packed (128-lane) covariance slab and the multi-chunk grids.
    bs2 = 4 * W_SIZE
    x2 = jax.random.normal(k_data2, (bs2 * NUM_SAMPLES, EMBED_DIM), dtype=jnp.float32)
    _run_case(x2, k_perm2, num_samples=NUM_SAMPLES, w_iter=2,
              w_size=W_SIZE, eps=EPS, label="multi")

    print("KERNEL_OK")
</pallas_src>

<mosaic_0001>
module attributes {stable_mosaic.version = 11 : i64} {
  func.func @_cov_kernel(%arg0: i32, %arg1: memref<1x32x32xf32, #tpu.memory_space<vmem>>, %arg2: memref<1x16x32xf32, #tpu.memory_space<vmem>>) attributes {dimension_semantics = [#tpu.dimension_semantics<parallel>], iteration_bounds = array<i64: 1>, scalar_prefetch = 0 : i64, scratch_operands = 0 : i64, tpu.core_type = #tpu.core_type<tc>, window_params = [{transform_indices = @transform_0, window_bounds = array<i64: 1, 32, 32>}, {transform_indices = @transform_1, window_bounds = array<i64: 1, 16, 32>}]} {
    %c0 = arith.constant 0 : index
    %c0_0 = arith.constant 0 : index
    %c0_1 = arith.constant 0 : index
    %0 = vector.load %arg1[%c0, %c0_0, %c0_1] : memref<1x32x32xf32, #tpu.memory_space<vmem>>, vector<1x32x32xf32>
    %1 = vector.shape_cast %0 : vector<1x32x32xf32> to vector<32x32xf32>
    %cst = arith.constant dense<0.000000e+00> : vector<32xf32>
    %2 = vector.multi_reduction <add>, %1, %cst [0] : vector<32x32xf32> to vector<32xf32>
    %3 = vector.shape_cast %2 : vector<32xf32> to vector<1x32xf32>
    %cst_2 = arith.constant 3.125000e-02 : f32
    %4 = vector.broadcast %cst_2 : f32 to vector<1x32xf32>
    %5 = arith.mulf %3, %4 : vector<1x32xf32>
    %6 = vector.broadcast %5 : vector<1x32xf32> to vector<32x32xf32>
    %7 = arith.subf %1, %6 : vector<32x32xf32>
    %cst_3 = arith.constant dense<0.000000e+00> : vector<32x32xf32>
    %8 = tpu.matmul %7, %7, %cst_3 {dimension_numbers = #tpu.dot_dimension_numbers<[0], [0], [1], [1], [0, 1, 1, 1], [], []>, precision = #tpu.contract_precision<fp32>} : vector<32x32xf32>, vector<32x32xf32>, vector<32x32xf32> -> vector<32x32xf32>
    %9 = vector.extract_strided_slice %8 {offsets = [0, 0], sizes = [16, 16], strides = [1, 1]} : vector<32x32xf32> to vector<16x16xf32>
    %cst_4 = arith.constant 0.0322580636 : f32
    %10 = vector.broadcast %cst_4 : f32 to vector<16x16xf32>
    %11 = arith.mulf %9, %10 : vector<16x16xf32>
    %12 = vector.extract_strided_slice %8 {offsets = [16, 16], sizes = [16, 16], strides = [1, 1]} : vector<32x32xf32> to vector<16x16xf32>
    %cst_5 = arith.constant 0.0322580636 : f32
    %13 = vector.broadcast %cst_5 : f32 to vector<16x16xf32>
    %14 = arith.mulf %12, %13 : vector<16x16xf32>
    %15 = tpu.concatenate %11, %14 in 1 : vector<16x16xf32>, vector<16x16xf32> -> vector<16x32xf32>
    %c0_6 = arith.constant 0 : index
    %c0_7 = arith.constant 0 : index
    %c0_8 = arith.constant 0 : index
    %16 = vector.load %arg2[%c0_6, %c0_7, %c0_8] : memref<1x16x32xf32, #tpu.memory_space<vmem>>, vector<1x16x32xf32>
    %17 = vector.shape_cast %16 : vector<1x16x32xf32> to vector<16x32xf32>
    %18 = vector.shape_cast %15 : vector<16x32xf32> to vector<1x16x32xf32>
    tpu.vector_store %arg2[%c0_6, %c0_7, %c0_8], %18 {strides = array<i32>} : memref<1x16x32xf32, #tpu.memory_space<vmem>>, vector<1x16x32xf32>,
    return
  }
  func.func @transform_0(%arg0: i32) -> (i32, i32, i32) {
    %c0_i32 = arith.constant 0 : i32
    %c0_i32_0 = arith.constant 0 : i32
    %c0_i32_1 = arith.constant 0 : i32
    return %arg0, %c0_i32, %c0_i32_0 : i32, i32, i32
  }
  func.func @transform_1(%arg0: i32) -> (i32, i32, i32) {
    %c0_i32 = arith.constant 0 : i32
    %c0_i32_0 = arith.constant 0 : i32
    %c0_i32_1 = arith.constant 0 : i32
    return %arg0, %c0_i32, %c0_i32_0 : i32, i32, i32
  }
}

module attributes {stable_mosaic.version = 11 : i64} {
  func.func @_whiten_loss_kernel(%arg0: i32, %arg1: memref<1x32x32xf32, #tpu.memory_space<vmem>>, %arg2: memref<1x32x32xf32, #tpu.memory_space<vmem>>, %arg3: memref<32x32xf32, #tpu.memory_space<vmem>>, %arg4: memref<32x16xf32, #tpu.memory_space<vmem>>, %arg5: memref<1x8x128xf32, #tpu.memory_space<vmem>>) attributes {dimension_semantics = [#tpu.dimension_semantics<parallel>], iteration_bounds = array<i64: 1>, scalar_prefetch = 0 : i64, scratch_operands = 0 : i64, tpu.core_type = #tpu.core_type<tc>, window_params = [{transform_indices = @transform_0, window_bounds = array<i64: 1, 32, 32>}, {transform_indices = @transform_1, window_bounds = array<i64: 1, 32, 32>}, {pipeline_mode = #tpu.pipeline_mode<synchronous>, transform_indices = @transform_2, window_bounds = array<i64: 32, 32>}, {pipeline_mode = #tpu.pipeline_mode<synchronous>, transform_indices = @transform_3, window_bounds = array<i64: 32, 16>}, {transform_indices = @transform_4, window_bounds = array<i64: 1, 8, 128>}]} {
    %c0 = arith.constant 0 : index
    %c0_0 = arith.constant 0 : index
    %c0_1 = arith.constant 0 : index
    %0 = vector.load %arg1[%c0, %c0_0, %c0_1] : memref<1x32x32xf32, #tpu.memory_space<vmem>>, vector<1x32x32xf32>
    %1 = vector.shape_cast %0 : vector<1x32x32xf32> to vector<32x32xf32>
    %cst = arith.constant dense<0.000000e+00> : vector<32xf32>
    %2 = vector.multi_reduction <add>, %1, %cst [0] : vector<32x32xf32> to vector<32xf32>
    %3 = vector.shape_cast %2 : vector<32xf32> to vector<1x32xf32>
    %cst_2 = arith.constant 3.125000e-02 : f32
    %4 = vector.broadcast %cst_2 : f32 to vector<1x32xf32>
    %5 = arith.mulf %3, %4 : vector<1x32xf32>
    %6 = vector.broadcast %5 : vector<1x32xf32> to vector<32x32xf32>
    %7 = arith.subf %1, %6 : vector<32x32xf32>
    %c0_3 = arith.constant 0 : index
    %c0_4 = arith.constant 0 : index
    %c0_5 = arith.constant 0 : index
    %8 = vector.load %arg2[%c0_3, %c0_4, %c0_5] : memref<1x32x32xf32, #tpu.memory_space<vmem>>, vector<1x32x32xf32>
    %9 = vector.shape_cast %8 : vector<1x32x32xf32> to vector<32x32xf32>
    %cst_6 = arith.constant dense<0.000000e+00> : vector<32x32xf32>
    %10 = tpu.matmul %7, %9, %cst_6 {dimension_numbers = #tpu.dot_dimension_numbers<[1], [0], [0], [1], [0, 0, 1, 1], [], []>, precision = #tpu.contract_precision<fp32>} : vector<32x32xf32>, vector<32x32xf32>, vector<32x32xf32> -> vector<32x32xf32>
    %11 = arith.mulf %10, %10 : vector<32x32xf32>
    %c0_7 = arith.constant 0 : index
    %c0_8 = arith.constant 0 : index
    %12 = vector.load %arg3[%c0_7, %c0_8] : memref<32x32xf32, #tpu.memory_space<vmem>>, vector<32x32xf32>
    %cst_9 = arith.constant dense<0.000000e+00> : vector<32x32xf32>
    %13 = tpu.matmul %11, %12, %cst_9 {dimension_numbers = #tpu.dot_dimension_numbers<[1], [0], [0], [1], [0, 0, 1, 1], [], []>, precision = #tpu.contract_precision<fp32>} : vector<32x32xf32>, vector<32x32xf32>, vector<32x32xf32> -> vector<32x32xf32>
    %cst_10 = arith.constant 1.000000e-24 : f32
    %14 = vector.broadcast %cst_10 : f32 to vector<32x32xf32>
    %15 = arith.maximumf %13, %14 : vector<32x32xf32>
    %16 = math.rsqrt %15 : vector<32x32xf32>
    %17 = arith.mulf %10, %16 : vector<32x32xf32>
    %c0_11 = arith.constant 0 : index
    %c0_12 = arith.constant 0 : index
    %18 = vector.load %arg4[%c0_11, %c0_12] : memref<32x16xf32, #tpu.memory_space<vmem>>, vector<32x16xf32>
    %cst_13 = arith.constant dense<0.000000e+00> : vector<32x16xf32>
    %19 = tpu.matmul %17, %18, %cst_13 {dimension_numbers = #tpu.dot_dimension_numbers<[1], [0], [0], [1], [0, 0, 1, 1], [], []>, precision = #tpu.contract_precision<fp32>} : vector<32x32xf32>, vector<32x16xf32>, vector<32x16xf32> -> vector<32x16xf32>
    %20 = arith.mulf %19, %19 : vector<32x16xf32>
    %cst_14 = arith.constant dense<0.000000e+00> : vector<32xf32>
    %21 = vector.multi_reduction <add>, %20, %cst_14 [1] : vector<32x16xf32> to vector<32xf32>
    %22 = vector.shape_cast %21 : vector<32xf32> to vector<32x1xf32>
    %cst_15 = arith.constant dense<0.000000e+00> : vector<1xf32>
    %23 = vector.multi_reduction <add>, %22, %cst_15 [0] : vector<32x1xf32> to vector<1xf32>
    %24 = vector.shape_cast %23 : vector<1xf32> to vector<1x1xf32>
    %25 = arith.mulf %17, %17 : vector<32x32xf32>
    %cst_16 = arith.constant dense<0.000000e+00> : vector<32xf32>
    %26 = vector.multi_reduction <add>, %25, %cst_16 [1] : vector<32x32xf32> to vector<32xf32>
    %27 = vector.shape_cast %26 : vector<32xf32> to vector<32x1xf32>
    %cst_17 = arith.constant dense<0.000000e+00> : vector<1xf32>
    %28 = vector.multi_reduction <add>, %27, %cst_17 [0] : vector<32x1xf32> to vector<1xf32>
    %29 = vector.shape_cast %28 : vector<1xf32> to vector<1x1xf32>
    %30 = arith.subf %24, %29 : vector<1x1xf32>
    %cst_18 = arith.constant 5.000000e-01 : f32
    %31 = vector.broadcast %cst_18 : f32 to vector<1x1xf32>
    %32 = arith.mulf %31, %30 : vector<1x1xf32>
    %33 = vector.shape_cast %32 : vector<1x1xf32> to vector<1x1xf32>
    %34 = vector.broadcast %33 : vector<1x1xf32> to vector<8x128xf32>
    %c0_19 = arith.constant 0 : index
    %c0_20 = arith.constant 0 : index
    %c0_21 = arith.constant 0 : index
    %35 = vector.load %arg5[%c0_19, %c0_20, %c0_21] : memref<1x8x128xf32, #tpu.memory_space<vmem>>, vector<1x8x128xf32>
    %36 = vector.shape_cast %35 : vector<1x8x128xf32> to vector<8x128xf32>
    %37 = vector.shape_cast %34 : vector<8x128xf32> to vector<1x8x128xf32>
    tpu.vector_store %arg5[%c0_19, %c0_20, %c0_21], %37 {strides = array<i32>} : memref<1x8x128xf32, #tpu.memory_space<vmem>>, vector<1x8x128xf32>,
    return
  }
  func.func @transform_0(%arg0: i32) -> (i32, i32, i32) {
    %c0_i32 = arith.constant 0 : i32
    %c0_i32_0 = arith.constant 0 : i32
    %c0_i32_1 = arith.constant 0 : i32
    return %arg0, %c0_i32, %c0_i32_0 : i32, i32, i32
  }
  func.func @transform_1(%arg0: i32) -> (i32, i32, i32) {
    %c0_i32 = arith.constant 0 : i32
    %c0_i32_0 = arith.constant 0 : i32
    %c0_i32_1 = arith.constant 0 : i32
    return %arg0, %c0_i32, %c0_i32_0 : i32, i32, i32
  }
  func.func @transform_2(%arg0: i32) -> (i32, i32) {
    %c0_i32 = arith.constant 0 : i32
    %c0_i32_0 = arith.constant 0 : i32
    %c0_i32_1 = arith.constant 0 : i32
    return %c0_i32, %c0_i32_0 : i32, i32
  }
  func.func @transform_3(%arg0: i32) -> (i32, i32) {
    %c0_i32 = arith.constant 0 : i32
    %c0_i32_0 = arith.constant 0 : i32
    %c0_i32_1 = arith.constant 0 : i32
    return %c0_i32, %c0_i32_0 : i32, i32
  }
  func.func @transform_4(%arg0: i32) -> (i32, i32, i32) {
    %c0_i32 = arith.constant 0 : i32
    %c0_i32_0 = arith.constant 0 : i32
    %c0_i32_1 = arith.constant 0 : i32
    return %arg0, %c0_i32, %c0_i32_0 : i32, i32, i32
  }
}

</mosaic_0001>

<bundles_post_ra>
// kernel: custom-call.3
= control target key start
LH: loop header
LB: loop body
LE: loop exit
PB: predicated region body
PF: predicated region fallthrough
CT: control target
= control target key end

     0   :  { %s870_s6 = smov 0   ;;  %s872_s7 = smov 0   ;;  %s1029_s0 = inlined_call_operand.vmem [shape: f32[2,16,16], index: 0, kind: input, shape index: {}]   ;;  %s1030_s1 = inlined_call_operand.vmem [shape: f32[2,16,16], index: 1, kind: output, shape index: {}]  }
   0x1   :  { %s874_s8 = smov 0  }
   0x2 LB: > { %s683_s9 = sadd.s32 4294967295, %s857_s8   ;;  %s26_s10 = sadd.s32 1, %s853_s7  ;;  %s857_s8 = sphi %s874_s8, %s7_s8   ;;  %s853_s7 = sphi %s872_s7, %s1032_s7   ;;  %s849_s6 = sphi %s870_s6, %s1031_s6  }
   0x3   : > { %p28_p0 = scmp.ge.s32.totalorder %s26_s10, 2  ;;  %p685_p1 = scmp.ge.s32.totalorder %s857_s8, 2 }
   0x4   : > { %s42_s11 = sand.u32 (!%p685_p1), 1, %s857_s8   ;;  %s776_s12 = sshll.u32 (!%p685_p1), %s853_s7, 4 }
   0x5   : > { %s1034_s10 = smov (%p28_p0, %s26_s10), 0  ;;  %40 = sbr.rel (%p685_p1) target bundleno = 12 (0xc), region = 16 }
   0x6   : > { %s686_s13 = sshll.u32 (!%p685_p1), %s42_s11, 4  ;;  %s49_s16 = scalar_lea.vmem (!%p685_p1), %s1029_s0, %s776_s12 }
   0x7   : > { %v79_v0 = vld [vmem:[%s49_s16] sm:$0xff] (!%p685_p1)  ;;  %v81_v1 = vld [vmem:[%s49_s16 + $0x8] sm:$0xff] (!%p685_p1)  ;;  %s44_s17 = scalar_lea.vmem (!%p685_p1), [#allocation0], %s686_s13 }
   0x8   : > { %80 = vst [vmem:[%s44_s17] sm:$0xff] (!%p685_p1), %v79_v0  ;;  %82 = vst [vmem:[%s44_s17 + $0x8] sm:$0xff] (!%p685_p1), %v81_v1 }
   0xc PF: > { %p689_p2 = scmp.ge.s32.totalorder %s857_s8, 1  ;;  %p87_p3 = scmp.lt.s32.totalorder %s857_s8, 3 }
   0xe   : > { %p88_p4 = pnand %p689_p2, %p87_p3 }
   0xf   : > { %s94_s18 = sand.u32 (!%p88_p4), 1, %s683_s9   ;;  %v859_v2 = vmov (!%p88_p4), 0.0   ;;  %vm108_vm0 = vcmask (!%p88_p4), 7168   ;;  %vm139_vm1 = vcmask (!%p88_p4), 15368   ;;  %vm156_vm2 = vcmask (!%p88_p4), 1047553   ;;  %s777_s22 = sshll.u32 (!%p88_p4), %s849_s6, 4 }
  0x10   : > { %91 = sbr.rel (%p88_p4) target bundleno = 2737 (0xab1), region = 54  ;;  %s690_s19 = sshll.u32 (!%p88_p4), %s94_s18, 4  ;;  %vm157_vm3 = vmand (!%p88_p4), %vm139_vm1, %vm156_vm2  ;;  %vm174_vm4 = vcmask (!%p88_p4), 23568   ;;  %vm191_vm5 = vcmask (!%p88_p4), 1047554   ;;  %vm209_vm7 = vcmask (!%p88_p4), 31768   ;;  %vm226_vm8 = vcmask (!%p88_p4), 1047555  }
  0x11   : > { %s897_s20 = scalar_lea.vmem (!%p88_p4), [#allocation1], %s690_s19  ;;  %s901_s21 = scalar_lea.vmem (!%p88_p4), [#allocation0], %s690_s19  ;;  %vm192_vm6 = vmand (!%p88_p4), %vm174_vm4, %vm191_vm5  ;;  %vm244_vm10 = vcmask (!%p88_p4), 39968   ;;  %vm261_vm11 = vcmask (!%p88_p4), 1047556   ;;  %vm279_vm13 = vcmask (!%p88_p4), 48168   ;;  %vm296_vm14 = vcmask (!%p88_p4), 1047557  }
  0x12   : > { %105 = vst [vmem:[%s897_s20] sm:$0xff] (!%p88_p4), %v859_v2  ;;  %v110_v6 = vld [vmem:[%s901_s21] ss:$0 sm:$0xff] (!%p88_p4)  ;;  %v909_v15 = vld [vmem:[%s901_s21 + $0x8] sm:$0xff] (!%p88_p4)  ;;  %v697_v24 = vld [vmem:[%s901_s21 + $0x1] ss:$0 sm:$0xff] (!%p88_p4)  ;;  %s1006_s25 = scalar_lea.vmem (!%p88_p4), %s1030_s1, %s777_s22 }
  0x13   : > { %v905_v10 = vld [vmem:[%s901_s21] sm:$0xff] (!%p88_p4)  ;;  %vm227_vm9 = vmand (!%p88_p4), %vm209_vm7, %vm226_vm8 }
  0x14   : > { %v702_v42 = vld [vmem:[%s901_s21 + $0x2] ss:$0 sm:$0xff] (!%p88_p4)  ;;  %v707_v60 = vld [vmem:[%s901_s21 + $0x3] ss:$0 sm:$0xff] (!%p88_p4)  ;;  %vm262_vm12 = vmand (!%p88_p4), %vm244_vm10, %vm261_vm11 }
  0x15   : > { %vm297_vm15 = vmand (!%p88_p4), %vm279_vm13, %vm296_vm14 }
  0x19   : > { %v109_v3 = vld [vmem:[%s897_s20] ss:$0 sm:$0xff] }
  0x1a   : > { %v111_v4 = vmul.f32 %v109_v3, %v109_v3  ;;  %v130_v5 = vmul.f32 0.0, %v109_v3 }
  0x1c   : > { %112 = vadd.xlane.f32.xlu0 %v111_v4  ;;  %131 = vadd.xlane.f32.xlu1 %v130_v5 }
  0x20   : > { %119 = vadd.xlane.f32.xlu0 %v130_v5 }
  0xa9   : > { %v113_v7 = vpop.xlane.xlu0 %112  ;;  %v132_v14 = vpop.xlane.xlu1 %131 }
  0xaa   : > { %v114_v8 = vsub.f32 %v110_v6, %v113_v7  ;;  %v133_v17 = vsub.f32 %v909_v15, %v132_v14 }
  0xac   : > { %803 = vrsqrt.f32 %v114_v8 }
  0xad   : > { %v120_v9 = vpop.xlane.xlu0 %119 }
  0xae   : > { %v121_v11 = vsub.f32 %v905_v10, %v120_v9 }
  0xb6   : > { %v804_v12 = vpop.eup %803 }
  0xb7   : > { %v122_v13 = vmul.f32 %v804_v12, %v121_v11  ;;  %v134_v18 = vmul.f32 %v804_v12, %v133_v17 }
  0xb9   : > { %v123_v16 = vsel %vm108_vm0, %v122_v13, 0.0  ;;  %v135_v19 = vsel %vm108_vm0, %v134_v18, 0.0  ;;  %vm314_vm0 = vcmask 56368  }
  0xba   : > { %125 = vst [vmem:[%s897_s20] sm:$0xff] %v123_v16 }
  0xc1   : > { %v696_v20 = vld [vmem:[%s897_s20 + $0x1] ss:$0 sm:$0xff] }
  0xc2   : > { %v151_v21 = vmul.f32 %v696_v20, %v123_v16  ;;  %v144_v22 = vmul.f32 %v696_v20, %v696_v20  ;;  %v165_v23 = vmul.f32 %v696_v20, %v135_v19 }
  0xc4   : > { %152 = vadd.xlane.f32.xlu0 %v151_v21  ;;  %145 = vadd.xlane.f32.xlu1 %v144_v22 }
  0xc8   : > { %166 = vadd.xlane.f32.xlu1 %v165_v23 }
 0x151   : > { %v146_v25 = vpop.xlane.xlu1 %145  ;;  %v153_v27 = vpop.xlane.xlu0 %152 }
 0x152   : > { %v147_v26 = vsub.f32 %v697_v24, %v146_v25  ;;  %v154_v28 = vsub.f32 %v905_v10, %v153_v27 }
 0x154   : > { %805 = vrsqrt.f32 %v147_v26 }
 0x155   : > { %v167_v33 = vpop.xlane.xlu1 %166 }
 0x156   : > { %v168_v34 = vsub.f32 %v909_v15, %v167_v33 }
 0x15e   : > { %v806_v29 = vpop.eup %805 }
 0x15f   : > { %v155_v30 = vmul.f32 %v806_v29, %v154_v28  ;;  %v169_v35 = vmul.f32 %v806_v29, %v168_v34  ;;  %v717_v34 = vld [vmem:[%s901_s21 + $0x5] ss:$0 sm:$0xff] }
 0x161   : > { %v158_v31 = vsel %vm157_vm3, %v155_v30, 0.0  ;;  %v170_v36 = vsel %vm139_vm1, %v169_v35, 0.0  ;;  %vm331_vm1 = vcmask 1047558  }
 0x162   : > { %v159_v32 = vadd.f32 %v158_v31, %v123_v16  ;;  %v171_v40 = vadd.f32 %v170_v36, %v135_v19  ;;  %v712_v16 = vld [vmem:[%s901_s21 + $0x4] ss:$0 sm:$0xff]  ;;  %vm332_vm3 = vmand %vm314_vm0, %vm331_vm1 }
 0x164   : > { %160 = vst [vmem:[%s897_s20] sm:$0xff] %v159_v32 }
 0x16b   : > { %v701_v37 = vld [vmem:[%s897_s20 + $0x2] ss:$0 sm:$0xff] }
 0x16c   : > { %v186_v38 = vmul.f32 %v701_v37, %v159_v32  ;;  %v179_v39 = vmul.f32 %v701_v37, %v701_v37  ;;  %v200_v41 = vmul.f32 %v701_v37, %v171_v40 }
 0x16e   : > { %187 = vadd.xlane.f32.xlu1 %v186_v38  ;;  %180 = vadd.xlane.f32.xlu0 %v179_v39 }
 0x172   : > { %201 = vadd.xlane.f32.xlu0 %v200_v41 }
 0x1fb   : > { %v181_v43 = vpop.xlane.xlu0 %180  ;;  %v188_v45 = vpop.xlane.xlu1 %187 }
 0x1fc   : > { %v182_v44 = vsub.f32 %v702_v42, %v181_v43  ;;  %v189_v46 = vsub.f32 %v905_v10, %v188_v45 }
 0x1fe   : > { %807 = vrsqrt.f32 %v182_v44 }
 0x1ff   : > { %v202_v51 = vpop.xlane.xlu0 %201 }
 0x200   : > { %v203_v52 = vsub.f32 %v909_v15, %v202_v51 }
 0x208   : > { %v808_v47 = vpop.eup %807 }
 0x209   : > { %v190_v48 = vmul.f32 %v808_v47, %v189_v46  ;;  %v204_v53 = vmul.f32 %v808_v47, %v203_v52  ;;  %v722_v52 = vld [vmem:[%s901_s21 + $0x6] ss:$0 sm:$0xff] }
 0x20b   : > { %v193_v49 = vsel %vm192_vm6, %v190_v48, 0.0  ;;  %v205_v54 = vsel %vm174_vm4, %v204_v53, 0.0  ;;  %vm349_vm4 = vcmask 64568   ;;  %vm384_vm6 = vcmask 72768  }
 0x20c   : > { %v194_v50 = vadd.f32 %v193_v49, %v159_v32  ;;  %v206_v58 = vadd.f32 %v205_v54, %v171_v40 }
 0x20e   : > { %195 = vst [vmem:[%s897_s20] sm:$0xff] %v194_v50 }
 0x215   : > { %v706_v55 = vld [vmem:[%s897_s20 + $0x3] ss:$0 sm:$0xff] }
 0x216   : > { %v221_v56 = vmul.f32 %v706_v55, %v194_v50  ;;  %v214_v57 = vmul.f32 %v706_v55, %v706_v55  ;;  %v235_v59 = vmul.f32 %v706_v55, %v206_v58 }
 0x218   : > { %222 = vadd.xlane.f32.xlu0 %v221_v56  ;;  %215 = vadd.xlane.f32.xlu1 %v214_v57 }
 0x21c   : > { %236 = vadd.xlane.f32.xlu1 %v235_v59 }
 0x2a5   : > { %v216_v61 = vpop.xlane.xlu1 %215  ;;  %v223_v63 = vpop.xlane.xlu0 %222 }
 0x2a6   : > { %v217_v62 = vsub.f32 %v707_v60, %v216_v61  ;;  %v224_v0 = vsub.f32 %v905_v10, %v223_v63 }
 0x2a8   : > { %809 = vrsqrt.f32 %v217_v62 }
 0x2a9   : > { %v237_v5 = vpop.xlane.xlu1 %236 }
 0x2aa   : > { %v238_v6 = vsub.f32 %v909_v15, %v237_v5  ;;  %v727_v5 = vld [vmem:[%s901_s21 + $0x7] ss:$0 sm:$0xff] }
 0x2b2   : > { %v810_v1 = vpop.eup %809 }
 0x2b3   : > { %v225_v2 = vmul.f32 %v810_v1, %v224_v0  ;;  %v239_v7 = vmul.f32 %v810_v1, %v238_v6 }
 0x2b5   : > { %v228_v3 = vsel %vm227_vm9, %v225_v2, 0.0  ;;  %v240_v8 = vsel %vm209_vm7, %v239_v7, 0.0  ;;  %vm407_vm7 = vcmask 80968  }
 0x2b6   : > { %v229_v4 = vadd.f32 %v228_v3, %v194_v50  ;;  %v241_v13 = vadd.f32 %v240_v8, %v206_v58  ;;  %vm427_vm9 = vmand %vm407_vm7, %vm156_vm2 }
 0x2b8   : > { %230 = vst [vmem:[%s897_s20] sm:$0xff] %v229_v4 }
 0x2bf   : > { %v711_v9 = vld [vmem:[%s897_s20 + $0x4] ss:$0 sm:$0xff] }
 0x2c0   : > { %v256_v11 = vmul.f32 %v711_v9, %v229_v4  ;;  %v249_v12 = vmul.f32 %v711_v9, %v711_v9  ;;  %v270_v14 = vmul.f32 %v711_v9, %v241_v13 }
 0x2c2   : > { %257 = vadd.xlane.f32.xlu1 %v256_v11  ;;  %250 = vadd.xlane.f32.xlu0 %v249_v12 }
 0x2c6   : > { %271 = vadd.xlane.f32.xlu0 %v270_v14 }
 0x34f   : > { %v251_v17 = vpop.xlane.xlu0 %250  ;;  %v258_v19 = vpop.xlane.xlu1 %257 }
 0x350   : > { %v252_v18 = vsub.f32 %v712_v16, %v251_v17  ;;  %v259_v20 = vsub.f32 %v905_v10, %v258_v19  ;;  %v732_v19 = vld [vmem:[%s901_s21 + $0x8] ss:$0 sm:$0xff] }
 0x352   : > { %811 = vrsqrt.f32 %v252_v18 }
 0x353   : > { %v272_v25 = vpop.xlane.xlu0 %271 }
 0x354   : > { %v273_v26 = vsub.f32 %v909_v15, %v272_v25 }
 0x35c   : > { %v812_v21 = vpop.eup %811 }
 0x35d   : > { %v260_v22 = vmul.f32 %v812_v21, %v259_v20  ;;  %v274_v27 = vmul.f32 %v812_v21, %v273_v26 }
 0x35f   : > { %v263_v23 = vsel %vm262_vm12, %v260_v22, 0.0  ;;  %v275_v28 = vsel %vm244_vm10, %v274_v27, 0.0  ;;  %vm432_vm10 = vcmask 89168   ;;  %vm457_vm12 = vcmask 97368  }
 0x360   : > { %v264_v24 = vadd.f32 %v263_v23, %v229_v4  ;;  %v276_v32 = vadd.f32 %v275_v28, %v241_v13  ;;  %vm452_vm2 = vmand %vm432_vm10, %vm191_vm5 }
 0x361   : > { %vm477_vm5 = vmand %vm457_vm12, %vm226_vm8 }
 0x362   : > { %265 = vst [vmem:[%s897_s20] sm:$0xff] %v264_v24 }
 0x369   : > { %v716_v29 = vld [vmem:[%s897_s20 + $0x5] ss:$0 sm:$0xff] }
 0x36a   : > { %v291_v30 = vmul.f32 %v716_v29, %v264_v24  ;;  %v284_v31 = vmul.f32 %v716_v29, %v716_v29  ;;  %v305_v33 = vmul.f32 %v716_v29, %v276_v32 }
 0x36c   : > { %292 = vadd.xlane.f32.xlu0 %v291_v30  ;;  %285 = vadd.xlane.f32.xlu1 %v284_v31  ;;  %v737_v31 = vld [vmem:[%s901_s21 + $0x9] ss:$0 sm:$0xff] }
 0x370   : > { %306 = vadd.xlane.f32.xlu1 %v305_v33 }
 0x3f9   : > { %v286_v35 = vpop.xlane.xlu1 %285  ;;  %v293_v37 = vpop.xlane.xlu0 %292 }
 0x3fa   : > { %v287_v36 = vsub.f32 %v717_v34, %v286_v35  ;;  %v294_v38 = vsub.f32 %v905_v10, %v293_v37 }
 0x3fc   : > { %813 = vrsqrt.f32 %v287_v36 }
 0x3fd   : > { %v307_v43 = vpop.xlane.xlu1 %306 }
 0x3fe   : > { %v308_v44 = vsub.f32 %v909_v15, %v307_v43  ;;  %v742_v43 = vld [vmem:[%s901_s21 + $0xa] ss:$0 sm:$0xff] }
 0x406   : > { %v814_v39 = vpop.eup %813 }
 0x407   : > { %v295_v40 = vmul.f32 %v814_v39, %v294_v38  ;;  %v309_v45 = vmul.f32 %v814_v39, %v308_v44 }
 0x409   : > { %v298_v41 = vsel %vm297_vm15, %v295_v40, 0.0  ;;  %v310_v46 = vsel %vm279_vm13, %v309_v45, 0.0  ;;  %vm482_vm13 = vcmask 105568   ;;  %vm507_vm15 = vcmask 113768  }
 0x40a   : > { %v299_v42 = vadd.f32 %v298_v41, %v264_v24  ;;  %v311_v50 = vadd.f32 %v310_v46, %v276_v32  ;;  %vm502_vm8 = vmand %vm482_vm13, %vm261_vm11 }
 0x40b   : > { %vm527_vm11 = vmand %vm507_vm15, %vm296_vm14  ;;  %vm366_vm14 = vcmask 1047559  }
 0x40c   : > { %300 = vst [vmem:[%s897_s20] sm:$0xff] %v299_v42 }
 0x413   : > { %v721_v47 = vld [vmem:[%s897_s20 + $0x6] ss:$0 sm:$0xff] }
 0x414   : > { %v326_v48 = vmul.f32 %v721_v47, %v299_v42  ;;  %v319_v49 = vmul.f32 %v721_v47, %v721_v47  ;;  %v340_v51 = vmul.f32 %v721_v47, %v311_v50 }
 0x416   : > { %327 = vadd.xlane.f32.xlu1 %v326_v48  ;;  %320 = vadd.xlane.f32.xlu0 %v319_v49 }
 0x41a   : > { %341 = vadd.xlane.f32.xlu0 %v340_v51 }
 0x4a3   : > { %v321_v53 = vpop.xlane.xlu0 %320  ;;  %v328_v55 = vpop.xlane.xlu1 %327 }
 0x4a4   : > { %v322_v54 = vsub.f32 %v722_v52, %v321_v53  ;;  %v329_v56 = vsub.f32 %v905_v10, %v328_v55  ;;  %v747_v55 = vld [vmem:[%s901_s21 + $0xb] ss:$0 sm:$0xff] }
 0x4a6   : > { %815 = vrsqrt.f32 %v322_v54 }
 0x4a7   : > { %v342_v58 = vpop.xlane.xlu0 %341 }
 0x4a8   : > { %v343_v61 = vsub.f32 %v909_v15, %v342_v58 }
 0x4b0   : > { %v816_v57 = vpop.eup %815 }
 0x4b1   : > { %v330_v59 = vmul.f32 %v816_v57, %v329_v56  ;;  %v344_v63 = vmul.f32 %v816_v57, %v343_v61 }
 0x4b3   : > { %v333_v60 = vsel %vm332_vm3, %v330_v59, 0.0  ;;  %v345_v0 = vsel %vm314_vm0, %v344_v63, 0.0  ;;  %vm367_vm0 = vmand %vm349_vm4, %vm366_vm14  ;;  %vm532_vm3 = vcmask 121968  }
 0x4b4   : > { %v948_v62 = vadd.f32 %v333_v60, %v299_v42  ;;  %v346_v1 = vadd.f32 %v345_v0, %v311_v50 }
 0x4b6   : > { %335 = vst [vmem:[%s897_s20] sm:$0xff] %v948_v62 }
 0x4bd   : > { %v953_v2 = vld [vmem:[%s897_s20 + $0x7] ss:$0 sm:$0xff] }
 0x4be   : > { %v375_v3 = vmul.f32 %v953_v2, %v346_v1  ;;  %v354_v4 = vmul.f32 %v953_v2, %v953_v2 }
 0x4c0   : > { %376 = vadd.xlane.f32.xlu0 %v375_v3  ;;  %355 = vadd.xlane.f32.xlu1 %v354_v4 }
 0x54d   : > { %v356_v6 = vpop.xlane.xlu1 %355  ;;  %v377_v8 = vpop.xlane.xlu0 %376 }
 0x54e   : > { %v357_v7 = vsub.f32 %v727_v5, %v356_v6  ;;  %v378_v9 = vsub.f32 %v909_v15, %v377_v8  ;;  %v752_v5 = vld [vmem:[%s901_s21 + $0xc] ss:$0 sm:$0xff] }
 0x550   : > { %817 = vrsqrt.f32 %v357_v7 }
 0x55a   : > { %v960_v11 = vpop.eup %817 }
 0x55b   : > { %v379_v12 = vmul.f32 %v960_v11, %v378_v9 }
 0x55d   : > { %v380_v13 = vsel %vm349_vm4, %v379_v12, 0.0  ;;  %vm552_vm4 = vmand %vm532_vm3, %vm331_vm1 }
 0x55e   : > { %v381_v14 = vadd.f32 %v380_v13, %v346_v1 }
 0x560   : > { %730 = vst [vmem:[%s897_s20 + $0x8] sm:$0xff] %v381_v14 }
 0x567   : > { %v731_v16 = vld [vmem:[%s897_s20 + $0x8] ss:$0 sm:$0xff] }
 0x568   : > { %v398_v17 = vmul.f32 %v731_v16, %v381_v14  ;;  %v389_v18 = vmul.f32 %v731_v16, %v731_v16 }
 0x56a   : > { %399 = vadd.xlane.f32.xlu0 %v398_v17  ;;  %390 = vadd.xlane.f32.xlu1 %v389_v18 }
 0x5f7   : > { %v391_v20 = vpop.xlane.xlu1 %390  ;;  %v400_v22 = vpop.xlane.xlu0 %399 }
 0x5f8   : > { %v392_v21 = vsub.f32 %v732_v19, %v391_v20  ;;  %v401_v23 = vsub.f32 %v909_v15, %v400_v22  ;;  %v757_v20 = vld [vmem:[%s901_s21 + $0xd] ss:$0 sm:$0xff] }
 0x5fa   : > { %819 = vrsqrt.f32 %v392_v21 }
 0x604   : > { %v820_v24 = vpop.eup %819 }
 0x605   : > { %v402_v25 = vmul.f32 %v820_v24, %v401_v23 }
 0x607   : > { %v403_v26 = vsel %vm384_vm6, %v402_v25, 0.0  ;;  %vm557_vm6 = vcmask 130168  }
 0x608   : > { %v404_v27 = vadd.f32 %v403_v26, %v381_v14  ;;  %vm577_vm1 = vmand %vm557_vm6, %vm366_vm14 }
 0x60a   : > { %735 = vst [vmem:[%s897_s20 + $0x8] sm:$0xff] %v404_v27 }
 0x611   : > { %v736_v28 = vld [vmem:[%s897_s20 + $0x9] ss:$0 sm:$0xff] }
 0x612   : > { %v421_v29 = vmul.f32 %v736_v28, %v404_v27  ;;  %v412_v30 = vmul.f32 %v736_v28, %v736_v28 }
 0x614   : > { %422 = vadd.xlane.f32.xlu0 %v421_v29  ;;  %413 = vadd.xlane.f32.xlu1 %v412_v30 }
 0x6a1   : > { %v414_v32 = vpop.xlane.xlu1 %413  ;;  %v423_v34 = vpop.xlane.xlu0 %422 }
 0x6a2   : > { %v415_v33 = vsub.f32 %v737_v31, %v414_v32  ;;  %v424_v35 = vsub.f32 %v909_v15, %v423_v34  ;;  %v361_v32 = vmul.f32 %v953_v2, %v948_v62 }
 0x6a4   : > { %821 = vrsqrt.f32 %v415_v33  ;;  %v762_v33 = vld [vmem:[%s901_s21 + $0xe] ss:$0 sm:$0xff] }
 0x6ae   : > { %v822_v36 = vpop.eup %821 }
 0x6af   : > { %v425_v37 = vmul.f32 %v822_v36, %v424_v35 }
 0x6b1   : > { %v428_v38 = vsel %vm427_vm9, %v425_v37, 0.0 }
 0x6b2   : > { %v429_v39 = vadd.f32 %v428_v38, %v404_v27 }
 0x6b4   : > { %740 = vst [vmem:[%s897_s20 + $0x8] sm:$0xff] %v429_v39 }
 0x6bb   : > { %v741_v40 = vld [vmem:[%s897_s20 + $0xa] ss:$0 sm:$0xff] }
 0x6bc   : > { %v446_v41 = vmul.f32 %v741_v40, %v429_v39  ;;  %v437_v42 = vmul.f32 %v741_v40, %v741_v40 }
 0x6be   : > { %447 = vadd.xlane.f32.xlu0 %v446_v41  ;;  %438 = vadd.xlane.f32.xlu1 %v437_v42 }
 0x74b   : > { %v439_v44 = vpop.xlane.xlu1 %438  ;;  %v448_v46 = vpop.xlane.xlu0 %447 }
 0x74c   : > { %v440_v45 = vsub.f32 %v742_v43, %v439_v44  ;;  %v449_v47 = vsub.f32 %v909_v15, %v448_v46 }
 0x74e   : > { %823 = vrsqrt.f32 %v440_v45 }
 0x758   : > { %v824_v48 = vpop.eup %823 }
 0x759   : > { %v450_v49 = vmul.f32 %v824_v48, %v449_v47  ;;  %v767_v47 = vld [vmem:[%s901_s21 + $0xf] ss:$0 sm:$0xff] }
 0x75b   : > { %v453_v50 = vsel %vm452_vm2, %v450_v49, 0.0 }
 0x75c   : > { %v454_v51 = vadd.f32 %v453_v50, %v429_v39 }
 0x75e   : > { %745 = vst [vmem:[%s897_s20 + $0x8] sm:$0xff] %v454_v51 }
 0x765   : > { %v746_v52 = vld [vmem:[%s897_s20 + $0xb] ss:$0 sm:$0xff] }
 0x766   : > { %v471_v53 = vmul.f32 %v746_v52, %v454_v51  ;;  %v462_v54 = vmul.f32 %v746_v52, %v746_v52 }
 0x768   : > { %472 = vadd.xlane.f32.xlu0 %v471_v53  ;;  %463 = vadd.xlane.f32.xlu1 %v462_v54 }
 0x7f5   : > { %v464_v56 = vpop.xlane.xlu1 %463  ;;  %v473_v58 = vpop.xlane.xlu0 %472 }
 0x7f6   : > { %v465_v57 = vsub.f32 %v747_v55, %v464_v56  ;;  %v474_v59 = vsub.f32 %v909_v15, %v473_v58 }
 0x7f8   : > { %825 = vrsqrt.f32 %v465_v57 }
 0x802   : > { %v826_v60 = vpop.eup %825 }
 0x803   : > { %v475_v61 = vmul.f32 %v826_v60, %v474_v59 }
 0x805   : > { %v478_v63 = vsel %vm477_vm5, %v475_v61, 0.0 }
 0x806   : > { %v479_v0 = vadd.f32 %v478_v63, %v454_v51 }
 0x808   : > { %750 = vst [vmem:[%s897_s20 + $0x8] sm:$0xff] %v479_v0 }
 0x80f   : > { %v751_v1 = vld [vmem:[%s897_s20 + $0xc] ss:$0 sm:$0xff] }
 0x810   : > { %v496_v3 = vmul.f32 %v751_v1, %v479_v0  ;;  %v487_v4 = vmul.f32 %v751_v1, %v751_v1 }
 0x812   : > { %497 = vadd.xlane.f32.xlu0 %v496_v3  ;;  %488 = vadd.xlane.f32.xlu1 %v487_v4 }
 0x89f   : > { %v489_v6 = vpop.xlane.xlu1 %488  ;;  %v498_v8 = vpop.xlane.xlu0 %497 }
 0x8a0   : > { %v490_v7 = vsub.f32 %v752_v5, %v489_v6  ;;  %v499_v9 = vsub.f32 %v909_v15, %v498_v8 }
 0x8a2   : > { %827 = vrsqrt.f32 %v490_v7 }
 0x8ac   : > { %v828_v12 = vpop.eup %827 }
 0x8ad   : > { %v500_v13 = vmul.f32 %v828_v12, %v499_v9 }
 0x8af   : > { %v503_v14 = vsel %vm502_vm8, %v500_v13, 0.0 }
 0x8b0   : > { %v504_v16 = vadd.f32 %v503_v14, %v479_v0 }
 0x8b2   : > { %755 = vst [vmem:[%s897_s20 + $0x8] sm:$0xff] %v504_v16 }
 0x8b9   : > { %v756_v17 = vld [vmem:[%s897_s20 + $0xd] ss:$0 sm:$0xff] }
 0x8ba   : > { %v521_v18 = vmul.f32 %v756_v17, %v504_v16  ;;  %v512_v19 = vmul.f32 %v756_v17, %v756_v17 }
 0x8bc   : > { %522 = vadd.xlane.f32.xlu0 %v521_v18  ;;  %513 = vadd.xlane.f32.xlu1 %v512_v19 }
 0x949   : > { %v514_v21 = vpop.xlane.xlu1 %513  ;;  %v523_v23 = vpop.xlane.xlu0 %522 }
 0x94a   : > { %v515_v22 = vsub.f32 %v757_v20, %v514_v21  ;;  %v524_v24 = vsub.f32 %v909_v15, %v523_v23 }
 0x94c   : > { %829 = vrsqrt.f32 %v515_v22 }
 0x956   : > { %v830_v25 = vpop.eup %829 }
 0x957   : > { %v525_v26 = vmul.f32 %v830_v25, %v524_v24 }
 0x959   : > { %v528_v27 = vsel %vm527_vm11, %v525_v26, 0.0 }
 0x95a   : > { %v529_v28 = vadd.f32 %v528_v27, %v504_v16 }
 0x95c   : > { %760 = vst [vmem:[%s897_s20 + $0x8] sm:$0xff] %v529_v28 }
 0x963   : > { %v761_v29 = vld [vmem:[%s897_s20 + $0xe] ss:$0 sm:$0xff] }
 0x964   : > { %v546_v30 = vmul.f32 %v761_v29, %v529_v28  ;;  %v537_v31 = vmul.f32 %v761_v29, %v761_v29 }
 0x966   : > { %547 = vadd.xlane.f32.xlu0 %v546_v30  ;;  %538 = vadd.xlane.f32.xlu1 %v537_v31 }
 0x96a   : > { %362 = vadd.xlane.f32.xlu0 %v361_v32 }
 0x9f3   : > { %v548_v34 = vpop.xlane.xlu0 %547  ;;  %v539_v35 = vpop.xlane.xlu1 %538 }
 0x9f4   : > { %v540_v36 = vsub.f32 %v762_v33, %v539_v35 }
 0x9f6   : > { %831 = vrsqrt.f32 %v540_v36 }
 0x9f7   : > { %v363_v37 = vpop.xlane.xlu0 %362 }
 0x9f8   : > { %v364_v38 = vsub.f32 %v905_v10, %v363_v37  ;;  %v549_v10 = vsub.f32 %v909_v15, %v548_v34 }
 0x9fa   : > { %v365_v39 = vmul.f32 %v960_v11, %v364_v38 }
 0x9fc   : > { %v368_v2 = vsel %vm367_vm0, %v365_v39, 0.0 }
 0x9fd   : > { %v369_v40 = vadd.f32 %v368_v2, %v948_v62 }
 0x9ff   : > { %370 = vst [vmem:[%s897_s20] sm:$0xff] %v369_v40  ;;  %621 = vst [vmem:[%s1006_s25] sm:$0xff] %v369_v40 }
 0xa00   : > { %v832_v41 = vpop.eup %831 }
 0xa01   : > { %v550_v42 = vmul.f32 %v832_v41, %v549_v10 }
 0xa03   : > { %v553_v11 = vsel %vm552_vm4, %v550_v42, 0.0 }
 0xa04   : > { %v554_v43 = vadd.f32 %v553_v11, %v529_v28 }
 0xa06   : > { %765 = vst [vmem:[%s897_s20 + $0x8] sm:$0xff] %v554_v43 }
 0xa0d   : > { %v766_v44 = vld [vmem:[%s897_s20 + $0xf] ss:$0 sm:$0xff] }
 0xa0e   : > { %v562_v45 = vmul.f32 %v766_v44, %v766_v44  ;;  %v571_v46 = vmul.f32 %v766_v44, %v554_v43 }
 0xa10   : > { %563 = vadd.xlane.f32.xlu1 %v562_v45 }
 0xa14   : > { %572 = vadd.xlane.f32.xlu1 %v571_v46 }
 0xa9d   : > { %v564_v62 = vpop.xlane.xlu1 %563 }
 0xa9e   : > { %v565_v48 = vsub.f32 %v767_v47, %v564_v62 }
 0xaa0   : > { %833 = vrsqrt.f32 %v565_v48 }
 0xaa1   : > { %v573_v49 = vpop.xlane.xlu1 %572 }
 0xaa2   : > { %v574_v50 = vsub.f32 %v909_v15, %v573_v49 }
 0xaaa   : > { %v834_v51 = vpop.eup %833 }
 0xaab   : > { %v575_v52 = vmul.f32 %v834_v51, %v574_v50 }
 0xaad   : > { %v578_v53 = vsel %vm577_vm1, %v575_v52, 0.0 }
 0xaae   : > { %v579_v54 = vadd.f32 %v578_v53, %v554_v43 }
 0xab0   : > { %770 = vst [vmem:[%s897_s20 + $0x8] sm:$0xff] %v579_v54  ;;  %623 = vst [vmem:[%s1006_s25 + $0x8] sm:$0xff] %v579_v54 }
 0xab1 PF: > { %s7_s8 = sadd.s32 1, %s857_s8   ;;  %s1031_s6 = smov %s853_s7 }
 0xab2   : > { %p4_p5 = scmp.ge.s32.totalorder %s7_s8, 4   ;;  %s1032_s7 = smov %s1034_s10 }
 0xab4   :  { %6 = sbr.rel (!%p4_p5) target bundleno = 2 (0x2), region = 197 }

// kernel: custom-call.4
= control target key start
LH: loop header
LB: loop body
LE: loop exit
PB: predicated region body
PF: predicated region fallthrough
CT: control target
= control target key end

     0   :  { %s552_s6 = smov 0   ;;  %s554_s7 = smov 0   ;;  %s641_s0 = inlined_call_operand.vmem [shape: f32[2,1,16,16], index: 0, kind: input, shape index: {}]   ;;  %s642_s1 = inlined_call_operand.vmem [shape: f32[2,1,16,16], index: 1, kind: output, shape index: {}]  }
   0x1   :  { %s556_s8 = smov 0  }
   0x2 LB: > { %s468_s9 = sadd.s32 4294967295, %s538_s8   ;;  %s33_s10 = sadd.s32 1, %s534_s7  ;;  %s538_s8 = sphi %s556_s8, %s7_s8   ;;  %s534_s7 = sphi %s554_s7, %s644_s7   ;;  %s530_s6 = sphi %s552_s6, %s643_s6  }
   0x3   : > { %p35_p0 = scmp.ge.s32.totalorder %s33_s10, 2  ;;  %p470_p1 = scmp.ge.s32.totalorder %s538_s8, 2 }
   0x4   : > { %s49_s11 = sand.u32 (!%p470_p1), 1, %s538_s8   ;;  %s484_s12 = sshll.u32 (!%p470_p1), %s534_s7, 4 }
   0x5   : > { %s646_s10 = smov (%p35_p0, %s33_s10), 0  ;;  %47 = sbr.rel (%p470_p1) target bundleno = 12 (0xc), region = 16 }
   0x6   : > { %s471_s13 = sshll.u32 (!%p470_p1), %s49_s11, 4  ;;  %s58_s16 = scalar_lea.vmem (!%p470_p1), %s641_s0, %s484_s12 }
   0x7   : > { %v88_v0 = vld [vmem:[%s58_s16] sm:$0xff] (!%p470_p1)  ;;  %v90_v1 = vld [vmem:[%s58_s16 + $0x8] sm:$0xff] (!%p470_p1)  ;;  %s51_s17 = scalar_lea.vmem (!%p470_p1), [#allocation0], %s471_s13 }
   0x8   : > { %89 = vst [vmem:[%s51_s17] sm:$0xff] (!%p470_p1), %v88_v0  ;;  %91 = vst [vmem:[%s51_s17 + $0x8] sm:$0xff] (!%p470_p1), %v90_v1 }
   0xc PF: > { %p474_p2 = scmp.ge.s32.totalorder %s538_s8, 1  ;;  %p96_p3 = scmp.lt.s32.totalorder %s538_s8, 3 }
   0xe   : > { %p97_p4 = pnand %p474_p2, %p96_p3 }
  0x10   : > { %100 = sbr.rel (%p97_p4) target bundleno = 2373 (0x945), region = 54 }
  0x17   : > { %s103_s18 = sand.u32 1, %s468_s9   ;;  %v114_v2 = vlaneseq  ;;  %v540_v11 = vmov -1.0   ;;  %v541_v55 = vmov 0.0   ;;  %s485_s21 = sshll.u32 %s530_s6, 4 }
  0x18   : > { %s475_s19 = sshll.u32 %s103_s18, 4  ;;  %s368_s24 = scalar_lea.vmem %s642_s1, %s485_s21 }
  0x19   : > { %v579_v3 = vand.u32 127, %v114_v2  ;;  %v118_v4 = vshrl.u32 %v114_v2, 7  ;;  %s581_s20 = scalar_lea.vmem [#allocation0], %s475_s19 }
  0x1a   : > { %v121_v5 = vld [vmem:[%s581_s20] sm:$0xff]  ;;  %v477_v38 = vld [vmem:[%s581_s20 + $0x8] sm:$0xff] }
  0x1b   : > { %vm120_vm0 = vcmp.eq.s32.totalorder %v118_v4, %v579_v3  ;;  %vm116_vm1 = vcmp.lt.s32.totalorder %v579_v3, 16  ;;  %vm125_vm2 = vcmp.ge.s32.totalorder %v118_v4, %v579_v3  ;;  %vm155_vm4 = vcmp.eq.s32.totalorder %v579_v3, 0 }
  0x1c   : > { %v122_v6 = vsel %vm120_vm0, %v121_v5, 0.0  ;;  %vm126_vm3 = vmand %vm125_vm2, %vm116_vm1  ;;  %vm152_vm5 = vcmp.eq.s32.totalorder %v579_v3, %v118_v4  ;;  %v156_v12 = vsel %vm155_vm4, 1.0, %v540_v11  ;;  %vm170_vm6 = vcmp.eq.s32.totalorder %v579_v3, 1 }
  0x1d   : > { %123 = vadd.xlane.f32.xlu0 %v122_v6  ;;  %v127_v8 = vsel %vm126_vm3, %v121_v5, 0.0  ;;  %v157_v13 = vsel %vm152_vm5, %v156_v12, 0.0  ;;  %vm180_vm7 = vcmp.eq.s32.totalorder %v579_v3, 2  ;;  %vm190_vm8 = vcmp.eq.s32.totalorder %v579_v3, 3 }
  0x1e   : > { %vm200_vm9 = vcmp.eq.s32.totalorder %v579_v3, 4  ;;  %v135_v33 = vadd.s32 8, %v118_v4  ;;  %vm210_vm11 = vcmp.eq.s32.totalorder %v579_v3, 5  ;;  %vm220_vm14 = vcmp.eq.s32.totalorder %v579_v3, 6 }
  0x1f   : > { %vm230_vm0 = vcmp.eq.s32.totalorder %v579_v3, 7  ;;  %vm254_vm2 = vcmp.eq.s32.totalorder %v579_v3, 9  ;;  %vm268_vm3 = vcmp.eq.s32.totalorder %v579_v3, 10  ;;  %vm282_vm4 = vcmp.eq.s32.totalorder %v579_v3, 11 }
  0x20   : > { %vm136_vm10 = vcmp.eq.s32.totalorder %v135_v33, %v579_v3  ;;  %vm141_vm12 = vcmp.ge.s32.totalorder %v135_v33, %v579_v3  ;;  %vm163_vm15 = vcmp.eq.s32.totalorder %v579_v3, %v135_v33  ;;  %vm296_vm5 = vcmp.eq.s32.totalorder %v579_v3, 12 }
  0x21   : > { %v138_v39 = vsel %vm136_vm10, %v477_v38, 0.0  ;;  %vm142_vm13 = vmand %vm141_vm12, %vm116_vm1  ;;  %v164_v56 = vsel %vm163_vm15, -1.0, %v541_v55  ;;  %vm240_vm1 = vcmp.eq.s32.totalorder %v579_v3, 8 }
  0x22   : > { %v143_v46 = vsel %vm142_vm13, %v477_v38, 0.0 }
  0xaa   : > { %v585_v7 = vpop.xlane.xlu0 %123 }
  0xab   : > { %512 = vrcp.f32 %v585_v7  ;;  %vm349_vm10 = vweird.f32 %v585_v7 }
  0xb5   : > { %v592_v9 = vpop.eup %512 }
  0xb6   : > { %v129_v10 = vmul.f32 %v592_v9, %v127_v8 }
  0xb8   : > { %130 = vst [vmem:[#allocation2] sm:$0xff] %v129_v10 }
  0xbf   : > { %v166_v14 = vld [vmem:[#allocation2 + $0x1] ss:$0 sm:$0xff]  ;;  %v176_v17 = vld [vmem:[#allocation2 + $0x2] ss:$0 sm:$0xff]  ;;  %v186_v22 = vld [vmem:[#allocation2 + $0x3] ss:$0 sm:$0xff] }
  0xc0   : > { %v167_v15 = vxor.u32 2147483648, %v166_v14  ;;  %v177_v19 = vxor.u32 2147483648, %v176_v17  ;;  %v187_v24 = vxor.u32 2147483648, %v186_v22  ;;  %v196_v27 = vld [vmem:[#allocation2 + $0x4] ss:$0 sm:$0xff] }
  0xc1   : > { %v197_v29 = vxor.u32 2147483648, %v196_v27  ;;  %v206_v32 = vld [vmem:[#allocation2 + $0x5] ss:$0 sm:$0xff]  ;;  %v216_v40 = vld [vmem:[#allocation2 + $0x6] ss:$0 sm:$0xff] }
  0xc2   : > { %v171_v16 = vmul.f32 %v167_v15, %v157_v13  ;;  %v207_v35 = vxor.u32 2147483648, %v206_v32  ;;  %v217_v42 = vxor.u32 2147483648, %v216_v40  ;;  %v226_v49 = vld [vmem:[#allocation2 + $0x7] ss:$0 sm:$0xff] }
  0xc3   : > { %v227_v52 = vxor.u32 2147483648, %v226_v49 }
  0xc4   : > { %172 = vadd.xlane.f32.xlu0 %v171_v16 }
 0x151   : > { %v173_v18 = vpop.xlane.xlu0 %172 }
 0x152   : > { %v174_v20 = vsel %vm170_vm6, %v173_v18, %v157_v13  ;;  %vm310_vm6 = vcmp.eq.s32.totalorder %v579_v3, 13 }
 0x153   : > { %v181_v21 = vmul.f32 %v177_v19, %v174_v20 }
 0x155   : > { %182 = vadd.xlane.f32.xlu1 %v181_v21 }
 0x1e2   : > { %v183_v23 = vpop.xlane.xlu1 %182 }
 0x1e3   : > { %v184_v25 = vsel %vm180_vm7, %v183_v23, %v174_v20  ;;  %vm324_vm7 = vcmp.eq.s32.totalorder %v579_v3, 14 }
 0x1e4   : > { %v191_v26 = vmul.f32 %v187_v24, %v184_v25 }
 0x1e6   : > { %192 = vadd.xlane.f32.xlu1 %v191_v26 }
 0x273   : > { %v193_v28 = vpop.xlane.xlu1 %192 }
 0x274   : > { %v194_v30 = vsel %vm190_vm8, %v193_v28, %v184_v25  ;;  %vm338_vm8 = vcmp.eq.s32.totalorder %v579_v3, 15 }
 0x275   : > { %v201_v31 = vmul.f32 %v197_v29, %v194_v30 }
 0x277   : > { %202 = vadd.xlane.f32.xlu0 %v201_v31 }
 0x304   : > { %v203_v34 = vpop.xlane.xlu0 %202 }
 0x305   : > { %v204_v36 = vsel %vm200_vm9, %v203_v34, %v194_v30 }
 0x306   : > { %v211_v37 = vmul.f32 %v207_v35, %v204_v36 }
 0x308   : > { %212 = vadd.xlane.f32.xlu1 %v211_v37 }
 0x30c   : > { %139 = vadd.xlane.f32.xlu1 %v138_v39 }
 0x395   : > { %v213_v41 = vpop.xlane.xlu1 %212 }
 0x396   : > { %v214_v43 = vsel %vm210_vm11, %v213_v41, %v204_v36 }
 0x397   : > { %v221_v44 = vmul.f32 %v217_v42, %v214_v43 }
 0x399   : > { %222 = vadd.xlane.f32.xlu0 %v221_v44  ;;  %v604_v45 = vpop.xlane.xlu1 %139 }
 0x39a   : > { %514 = vrcp.f32 %v604_v45  ;;  %vm354_vm9 = vweird.f32 %v604_v45 }
 0x3a4   : > { %v610_v47 = vpop.eup %514 }
 0x3a5   : > { %v145_v48 = vmul.f32 %v610_v47, %v143_v46 }
 0x3a7   : > { %146 = vst [vmem:[#allocation2 + $0x8] sm:$0xff] %v145_v48 }
 0x3ae   : > { %v236_v50 = vld [vmem:[#allocation2 + $0x8] ss:$0 sm:$0xff]  ;;  %v250_v61 = vld [vmem:[#allocation2 + $0x9] ss:$0 sm:$0xff]  ;;  %v264_v6 = vld [vmem:[#allocation2 + $0xa] ss:$0 sm:$0xff] }
 0x3af   : > { %v237_v53 = vxor.u32 2147483648, %v236_v50  ;;  %v251_v0 = vxor.u32 2147483648, %v250_v61  ;;  %v265_v11 = vxor.u32 2147483648, %v264_v6  ;;  %v278_v16 = vld [vmem:[#allocation2 + $0xb] ss:$0 sm:$0xff] }
 0x3b0   : > { %v279_v19 = vxor.u32 2147483648, %v278_v16  ;;  %v292_v24 = vld [vmem:[#allocation2 + $0xc] ss:$0 sm:$0xff]  ;;  %v306_v32 = vld [vmem:[#allocation2 + $0xd] ss:$0 sm:$0xff] }
 0x3b1   : > { %v245_v58 = vmul.f32 %v237_v53, %v164_v56  ;;  %v293_v27 = vxor.u32 2147483648, %v292_v24  ;;  %v307_v35 = vxor.u32 2147483648, %v306_v32  ;;  %v320_v40 = vld [vmem:[#allocation2 + $0xe] ss:$0 sm:$0xff]  ;;  %v334_v50 = vld [vmem:[#allocation2 + $0xf] ss:$0 sm:$0xff] }
 0x426   : > { %v223_v51 = vpop.xlane.xlu0 %222 }
 0x427   : > { %v224_v54 = vsel %vm220_vm14, %v223_v51, %v214_v43  ;;  %v321_v43 = vxor.u32 2147483648, %v320_v40 }
 0x428   : > { %v231_v57 = vmul.f32 %v227_v52, %v224_v54 }
 0x42a   : > { %232 = vadd.xlane.f32.xlu0 %v231_v57 }
 0x42e   : > { %246 = vadd.xlane.f32.xlu0 %v245_v58 }
 0x4b7   : > { %v233_v59 = vpop.xlane.xlu0 %232 }
 0x4b8   : > { %v234_v60 = vsel %vm230_vm0, %v233_v59, %v224_v54 }
 0x4b9   : > { %v241_v62 = vmul.f32 %v237_v53, %v234_v60  ;;  %v335_v53 = vxor.u32 2147483648, %v334_v50 }
 0x4bb   : > { %v247_v63 = vpop.xlane.xlu0 %246  ;;  %242 = vadd.xlane.f32.xlu1 %v241_v62 }
 0x4bc   : > { %v248_v1 = vsel %vm240_vm1, %v247_v63, %v164_v56 }
 0x4bd   : > { %v259_v2 = vmul.f32 %v251_v0, %v248_v1 }
 0x4bf   : > { %260 = vadd.xlane.f32.xlu0 %v259_v2 }
 0x548   : > { %v243_v4 = vpop.xlane.xlu1 %242 }
 0x549   : > { %v244_v5 = vsel %vm240_vm1, %v243_v4, %v234_v60 }
 0x54a   : > { %v255_v8 = vmul.f32 %v251_v0, %v244_v5 }
 0x54c   : > { %v261_v10 = vpop.xlane.xlu0 %260  ;;  %256 = vadd.xlane.f32.xlu1 %v255_v8 }
 0x54d   : > { %v262_v12 = vsel %vm254_vm2, %v261_v10, %v248_v1 }
 0x54e   : > { %v273_v13 = vmul.f32 %v265_v11, %v262_v12 }
 0x550   : > { %274 = vadd.xlane.f32.xlu0 %v273_v13 }
 0x5d9   : > { %v257_v14 = vpop.xlane.xlu1 %256 }
 0x5da   : > { %v258_v15 = vsel %vm254_vm2, %v257_v14, %v244_v5 }
 0x5db   : > { %v269_v17 = vmul.f32 %v265_v11, %v258_v15 }
 0x5dd   : > { %v275_v18 = vpop.xlane.xlu0 %274  ;;  %270 = vadd.xlane.f32.xlu1 %v269_v17 }
 0x5de   : > { %v276_v20 = vsel %vm268_vm3, %v275_v18, %v262_v12 }
 0x5df   : > { %v287_v21 = vmul.f32 %v279_v19, %v276_v20 }
 0x5e1   : > { %288 = vadd.xlane.f32.xlu0 %v287_v21 }
 0x66a   : > { %v271_v22 = vpop.xlane.xlu1 %270 }
 0x66b   : > { %v272_v23 = vsel %vm268_vm3, %v271_v22, %v258_v15 }
 0x66c   : > { %v283_v25 = vmul.f32 %v279_v19, %v272_v23 }
 0x66e   : > { %v289_v26 = vpop.xlane.xlu0 %288  ;;  %284 = vadd.xlane.f32.xlu1 %v283_v25 }
 0x66f   : > { %v290_v28 = vsel %vm282_vm4, %v289_v26, %v276_v20 }
 0x670   : > { %v301_v29 = vmul.f32 %v293_v27, %v290_v28 }
 0x672   : > { %302 = vadd.xlane.f32.xlu0 %v301_v29 }
 0x6fb   : > { %v285_v30 = vpop.xlane.xlu1 %284 }
 0x6fc   : > { %v286_v31 = vsel %vm282_vm4, %v285_v30, %v272_v23 }
 0x6fd   : > { %v297_v33 = vmul.f32 %v293_v27, %v286_v31 }
 0x6ff   : > { %v303_v34 = vpop.xlane.xlu0 %302  ;;  %298 = vadd.xlane.f32.xlu1 %v297_v33 }
 0x700   : > { %v304_v36 = vsel %vm296_vm5, %v303_v34, %v290_v28 }
 0x701   : > { %v315_v37 = vmul.f32 %v307_v35, %v304_v36 }
 0x703   : > { %316 = vadd.xlane.f32.xlu0 %v315_v37 }
 0x78c   : > { %v299_v38 = vpop.xlane.xlu1 %298 }
 0x78d   : > { %v300_v39 = vsel %vm296_vm5, %v299_v38, %v286_v31 }
 0x78e   : > { %v311_v41 = vmul.f32 %v307_v35, %v300_v39 }
 0x790   : > { %v317_v42 = vpop.xlane.xlu0 %316  ;;  %312 = vadd.xlane.f32.xlu1 %v311_v41 }
 0x791   : > { %v318_v44 = vsel %vm310_vm6, %v317_v42, %v304_v36 }
 0x792   : > { %v329_v46 = vmul.f32 %v321_v43, %v318_v44 }
 0x794   : > { %330 = vadd.xlane.f32.xlu0 %v329_v46 }
 0x81d   : > { %v313_v48 = vpop.xlane.xlu1 %312 }
 0x81e   : > { %v314_v49 = vsel %vm310_vm6, %v313_v48, %v300_v39 }
 0x81f   : > { %v325_v51 = vmul.f32 %v321_v43, %v314_v49 }
 0x821   : > { %v331_v52 = vpop.xlane.xlu0 %330  ;;  %326 = vadd.xlane.f32.xlu1 %v325_v51 }
 0x822   : > { %v332_v54 = vsel %vm324_vm7, %v331_v52, %v318_v44 }
 0x823   : > { %v343_v55 = vmul.f32 %v335_v53, %v332_v54 }
 0x825   : > { %344 = vadd.xlane.f32.xlu0 %v343_v55 }
 0x8ae   : > { %v327_v56 = vpop.xlane.xlu1 %326 }
 0x8af   : > { %v328_v57 = vsel %vm324_vm7, %v327_v56, %v314_v49 }
 0x8b0   : > { %v339_v58 = vmul.f32 %v335_v53, %v328_v57 }
 0x8b2   : > { %v345_v59 = vpop.xlane.xlu0 %344  ;;  %340 = vadd.xlane.f32.xlu1 %v339_v58 }
 0x8b3   : > { %v346_v60 = vsel %vm338_vm8, %v345_v59, %v332_v54 }
 0x8b4   : > { %v353_v61 = vmul.f32 %v610_v47, %v346_v60 }
 0x8b6   : > { %v355_v62 = vsel %vm354_vm9, %v346_v60, %v353_v61 }
 0x8b7   : > { %401 = vst [vmem:[%s368_s24 + $0x8] sm:$0xff] %v355_v62 }
 0x93f   : > { %v341_v63 = vpop.xlane.xlu1 %340 }
 0x940   : > { %v342_v0 = vsel %vm338_vm8, %v341_v63, %v328_v57 }
 0x941   : > { %v348_v1 = vmul.f32 %v592_v9, %v342_v0 }
 0x943   : > { %v350_v3 = vsel %vm349_vm10, %v342_v0, %v348_v1 }
 0x944   : > { %399 = vst [vmem:[%s368_s24] sm:$0xff] %v350_v3 }
 0x945 PF: > { %s7_s8 = sadd.s32 1, %s538_s8   ;;  %s643_s6 = smov %s534_s7 }
 0x946   : > { %p4_p5 = scmp.ge.s32.totalorder %s7_s8, 4   ;;  %s644_s7 = smov %s646_s10 }
 0x948   :  { %6 = sbr.rel (!%p4_p5) target bundleno = 2 (0x2), region = 136 }

// kernel: wmse_loss.4
= control target key start
LH: loop header
LB: loop body
LE: loop exit
PB: predicated region body
PF: predicated region fallthrough
CT: control target
= control target key end

     0   :  { %vm12_vm0 = vcmask 261120   ;;  %vm693_vm1 = vcmask 130048   ;;  %s957_s0 = inlined_call_operand.vmem [shape: f32[1,32,32], index: 0, kind: input, shape index: {}]   ;;  %s958_s1 = inlined_call_operand.vmem [shape: f32[1,16,32], index: 1, kind: output, shape index: {}]  }
   0x1   :  { %v8_v0 = vld [vmem:[%s957_s0] sm:$0xff]  ;;  %v9_v1 = vld [vmem:[%s957_s0 + $0x8] sm:$0xff]  ;;  %v10_v2 = vld [vmem:[%s957_s0 + $0x10] sm:$0xff] }
   0x2   :  { %v11_v3 = vld [vmem:[%s957_s0 + $0x18] sm:$0xff]  ;;  %v13_v4 = vsel %vm12_vm0, %v8_v0, 0.0  ;;  %v14_v5 = vsel %vm12_vm0, %v9_v1, 0.0  ;;  %v16_v6 = vsel %vm12_vm0, %v10_v2, 0.0 }
   0x3   :  { %v15_v7 = vadd.f32 %v14_v5, %v13_v4  ;;  %v18_v8 = vsel %vm12_vm0, %v11_v3, 0.0 }
   0x5   :  { %v17_v9 = vadd.f32 %v16_v6, %v15_v7 }
   0x7   :  { %v19_v10 = vadd.f32 %v18_v8, %v17_v9 }
   0x9   :  { %v20_v11 = vrot.slane %v19_v10, 4 }
   0xb   :  { %v21_v12 = vadd.f32 %v20_v11, %v19_v10 }
   0xd   :  { %v22_v13 = vrot.slane %v21_v12, 2 }
   0xf   :  { %v23_v14 = vadd.f32 %v22_v13, %v21_v12 }
  0x11   :  { %v24_v15 = vrot.slane %v23_v14, 1 }
  0x13   :  { %v25_v16 = vadd.f32 %v24_v15, %v23_v14 }
  0x15   :  { %v26_v17 = vmul.f32 0.03125, %v25_v16 }
  0x17   :  { %v27_v18 = vsub.f32 %v8_v0, %v26_v17  ;;  %v28_v19 = vsub.f32 %v9_v1, %v26_v17  ;;  %v29_v20 = vsub.f32 %v10_v2, %v26_v17  ;;  %v30_v21 = vsub.f32 %v11_v3, %v26_v17 }
  0x19   :  { %31 = vxpose.xlu0.b32.start [1/4] (short) (narrow) %v27_v18, 32  ;;  %v76_v22 = vand.u32 4294901760, %v27_v18  ;;  %v79_v23 = vand.u32 4294901760, %v28_v19  ;;  %v82_v24 = vand.u32 4294901760, %v29_v20  ;;  %v85_v25 = vand.u32 4294901760, %v30_v21 }
  0x1b   :  { %v929_v26 = vpack.c.bf16 %v79_v23, %v76_v22  ;;  %v200_v27 = vsub.f32 %v29_v20, %v82_v24  ;;  %v931_v28 = vpack.c.bf16 %v85_v25, %v82_v24  ;;  %v207_v29 = vsub.f32 %v30_v21, %v85_v25 }
  0x1c   :  { %v186_v30 = vsub.f32 %v27_v18, %v76_v22  ;;  %v193_v31 = vsub.f32 %v28_v19, %v79_v23 }
  0x1d   :  { %32 = vxpose.xlu0.b32.cont [2/4] (short) (narrow) %v28_v19, 32  ;;  %859 = vmatprep.subr.bf16.mxu0 %v929_v26  ;;  %v201_v39 = vand.u32 4294901760, %v200_v27  ;;  %v208_v40 = vand.u32 4294901760, %v207_v29  ;;  %v854_v49 = vpack.c.bf16 %v207_v29, %v200_v27 }
  0x1e   :  { %861 = vmatpush3.bf16.msra.mxu0 %v929_v26  ;;  %835 = vmatprep.subr.bf16.mxu1 %v929_v26  ;;  %v187_v32 = vand.u32 4294901760, %v186_v30  ;;  %v194_v33 = vand.u32 4294901760, %v193_v31  ;;  %v850_v48 = vpack.c.bf16 %v193_v31, %v186_v30 }
  0x1f   :  { %863 = vmatprep.subr.bf16.mxu0 %v931_v28  ;;  %837 = vmatpush3.bf16.msra.mxu1 %v929_v26  ;;  %v870_v42 = vpack.c.bf16 %v208_v40, %v201_v39  ;;  %v202_v43 = vsub.f32 %v200_v27, %v201_v39  ;;  %v209_v44 = vsub.f32 %v207_v29, %v208_v40 }
  0x20   :  { %839 = vmatprep.subr.bf16.mxu1 %v931_v28  ;;  %v866_v34 = vpack.c.bf16 %v194_v33, %v187_v32  ;;  %v188_v35 = vsub.f32 %v186_v30, %v187_v32  ;;  %v195_v36 = vsub.f32 %v193_v31, %v194_v33 }
  0x21   :  { %33 = vxpose.xlu0.b32.cont [3/4] (short) (narrow) %v29_v20, 32  ;;  %v203_v45 = vand.u32 4294901760, %v202_v43  ;;  %v210_v46 = vand.u32 4294901760, %v209_v44 }
  0x22   :  { %865 = vmatpush3.bf16.msra.mxu0 %v931_v28  ;;  %v189_v37 = vand.u32 4294901760, %v188_v35  ;;  %v196_v38 = vand.u32 4294901760, %v195_v36 }
  0x23   :  { %841 = vmatpush3.bf16.msra.mxu1 %v931_v28  ;;  %867 = vmatprep.subr.bf16.mxu0 %v866_v34  ;;  %v846_v47 = vpack.c.bf16 %v210_v46, %v203_v45 }
  0x24   :  { %v842_v41 = vpack.c.bf16 %v196_v38, %v189_v37 }
  0x25   :  { %34 = vxpose.xlu0.b32.end [4/4] (short) (narrow) %v30_v21, 32 }
  0x26   :  { %843 = vmatprep.subr.bf16.mxu1 %v842_v41 }
  0x99   :  { %v47_v50 = vpop.trf.xlu0 }
  0x9a   :  { %v64_v51 = vsel %vm12_vm0, %v47_v50, 0 }
  0x9b   :  { %v144_v52 = vand.u32 4294901760, %v64_v51 }
  0x9d   :  { %v145_v53 = vsub.f32 %v64_v51, %v144_v52  ;;  %v48_v54 = vpop.trf.xlu0 }
  0x9e   :  { %v67_v55 = vsel %vm12_vm0, %v48_v54, 0 }
  0x9f   :  { %v154_v56 = vand.u32 4294901760, %v67_v55  ;;  %v146_v57 = vand.u32 4294901760, %v145_v53 }
  0xa1   :  { %v155_v58 = vsub.f32 %v67_v55, %v154_v56  ;;  %800 = vmatprep.mubr.f32.mxu0 %v146_v57  ;;  %v49_v59 = vpop.trf.xlu0  ;;  %v147_v60 = vsub.f32 %v145_v53, %v146_v57 }
  0xa2   :  { %v70_v61 = vsel %vm12_vm0, %v49_v59, 0 }
  0xa3   :  { %v164_v62 = vand.u32 4294901760, %v70_v61  ;;  %v148_v63 = vand.u32 4294901760, %v147_v60  ;;  %v156_v0 = vand.u32 4294901760, %v155_v58 }
  0xa5   :  { %v165_v1 = vsub.f32 %v70_v61, %v164_v62  ;;  %758 = vmatprep.mubr.f32.mxu1 %v148_v63  ;;  %v50_v2 = vpop.trf.xlu0  ;;  %801 = vmatmul.mubr.f32.vlgmr.msra.gmra.mrb[0].mxu0 %v156_v0  ;;  %v157_v3 = vsub.f32 %v155_v58, %v156_v0 }
  0xa6   :  { %v73_v4 = vsel %vm12_vm0, %v50_v2, 0  ;;  %869 = vmatpush3.bf16.msra.mxu0 %v866_v34 }
  0xa7   :  { %v174_v5 = vand.u32 4294901760, %v73_v4  ;;  %v158_v6 = vand.u32 4294901760, %v157_v3  ;;  %v166_v7 = vand.u32 4294901760, %v165_v1  ;;  %871 = vmatprep.subr.bf16.mxu0 %v870_v42 }
  0xa9   :  { %v175_v8 = vsub.f32 %v73_v4, %v174_v5  ;;  %759 = vmatmul.mubr.f32.vlgmr.msra.gmra.mrb[0].mxu1 %v158_v6  ;;  %803 = vmatprep.mubr.f32.mxu0 %v166_v7  ;;  %v167_v9 = vsub.f32 %v165_v1, %v166_v7 }
  0xaa   :  { %845 = vmatpush3.bf16.msra.mxu1 %v842_v41  ;;  %873 = vmatpush3.bf16.msra.mxu0 %v870_v42 }
  0xab   :  { %v168_v10 = vand.u32 4294901760, %v167_v9  ;;  %v176_v11 = vand.u32 4294901760, %v175_v8  ;;  %847 = vmatprep.subr.bf16.mxu1 %v846_v47  ;;  %875 = vmatprep.subr.bf16.mxu0 %v929_v26 }
  0xad   :  { %761 = vmatprep.mubr.f32.mxu1 %v168_v10  ;;  %804 = vmatmul.mubr.f32.gmra.mrb[2].mxu0 %v176_v11  ;;  %v177_v12 = vsub.f32 %v175_v8, %v176_v11 }
  0xae   :  { %814 = vmatprep.mubr.f32.mxu0 %v144_v52  ;;  %849 = vmatpush3.bf16.msra.mxu1 %v846_v47 }
  0xaf   :  { %v178_v13 = vand.u32 4294901760, %v177_v12  ;;  %851 = vmatprep.subr.bf16.mxu1 %v850_v48 }
  0xb1   :  { %762 = vmatmul.mubr.f32.gmra.mrb[2].mxu1 %v178_v13  ;;  %815 = vmatmul.mubr.f32.vlgmr.msra.gmra.mrb[0].mxu0 %v154_v56 }
  0xb2   :  { %772 = vmatprep.mubr.f32.mxu1 %v144_v52  ;;  %817 = vmatprep.mubr.f32.mxu0 %v164_v62 }
  0xb3   :  { %877 = vmatpush3.bf16.msra.mxu0 %v929_v26 }
  0xb4   :  { %879 = vmatprep.subr.bf16.mxu0 %v931_v28 }
  0xb5   :  { %773 = vmatmul.mubr.f32.vlgmr.msra.gmra.mrb[0].mxu1 %v154_v56  ;;  %818 = vmatmul.mubr.f32.gmra.mrb[2].mxu0 %v174_v5 }
  0xb6   :  { %853 = vmatpush3.bf16.msra.mxu1 %v850_v48  ;;  %775 = vmatprep.mubr.f32.mxu1 %v164_v62 }
  0xb7   :  { %881 = vmatpush3.bf16.msra.mxu0 %v931_v28  ;;  %828 = vmatprep.mubr.f32.mxu0 %v144_v52 }
  0xb8   :  { %855 = vmatprep.subr.bf16.mxu1 %v854_v49 }
  0xb9   :  { %776 = vmatmul.mubr.f32.gmra.mrb[2].mxu1 %v174_v5 }
  0xba   :  { %857 = vmatpush3.bf16.msra.mxu1 %v854_v49  ;;  %829 = vmatmul.mubr.f32.vlgmr.msra.gmra.mrb[0].mxu0 %v154_v56 }
  0xbb   :  { %786 = vmatprep.mubr.f32.mxu1 %v145_v53  ;;  %831 = vmatprep.mubr.f32.mxu0 %v164_v62 }
  0xbd   :  { %787 = vmatmul.mubr.f32.vlgmr.msra.gmra.mrb[0].mxu1 %v155_v58 }
  0xbe   :  { %832 = vmatmul.mubr.f32.gmra.mrb[2].mxu0 %v174_v5  ;;  %789 = vmatprep.mubr.f32.mxu1 %v165_v1 }
  0xc1   :  { %790 = vmatmul.mubr.f32.gmra.mrb[2].mxu1 %v175_v8 }
 0x18d   :  { %v830_v14 = vpop.f32.mrb[0].mxu0 }
 0x18e   :  { %v667_v15 = vpop.f32.mrb[1].mxu0 }
 0x190   :  { %v788_v16 = vpop.f32.mrb[0].mxu1 }
 0x191   :  { %v882_v17 = vadd.f32 %v830_v14, %v788_v16  ;;  %v833_v18 = vpop.f32.mrb[2].mxu0  ;;  %v369_v19 = vpop.f32.mrb[1].mxu1 }
 0x192   :  { %v883_v20 = vadd.f32 %v667_v15, %v369_v19  ;;  %v679_v21 = vpop.f32.mrb[3].mxu0 }
 0x193   :  { %v690_v26 = vmul.f32 0.032258064, %v882_v17 }
 0x194   :  { %v791_v22 = vpop.f32.mrb[2].mxu1  ;;  %v689_v28 = vmul.f32 0.032258064, %v883_v20 }
 0x195   :  { %v884_v23 = vadd.f32 %v833_v18, %v791_v22  ;;  %v383_v24 = vpop.f32.mrb[3].mxu1 }
 0x196   :  { %v885_v25 = vadd.f32 %v679_v21, %v383_v24 }
 0x197   :  { %v692_v27 = vmul.f32 0.032258064, %v884_v23 }
 0x198   :  { %v691_v29 = vmul.f32 0.032258064, %v885_v25 }
 0x199   :  { %v695_v30 = vsel %vm693_vm1, %v690_v26, %v692_v27 }
 0x19a   :  { %697 = vst.msk [vmem:[%s958_s1 + $0x8] sm:$0xff] %vm12_vm0, %v695_v30  ;;  %v694_v31 = vsel %vm693_vm1, %v689_v28, %v691_v29 }
 0x19b   :  { %696 = vst.msk [vmem:[%s958_s1] sm:$0xff] %vm12_vm0, %v694_v31 }

// kernel: wmse_loss.5
= control target key start
LH: loop header
LB: loop body
LE: loop exit
PB: predicated region body
PF: predicated region fallthrough
CT: control target
= control target key end

     0   :  { %vm21_vm0 = vcmask 261120   ;;  %vm1950_vm1 = vcmask 130048   ;;  %s2842_s1 = inlined_call_operand.vmem [shape: f32[1,32,32], index: 1, kind: input, shape index: {}]   ;;  %s2843_s0 = inlined_call_operand.vmem [shape: f32[1,32,32], index: 0, kind: input, shape index: {}]   ;;  %s2844_s2 = inlined_call_operand.vmem [shape: f32[32,32], index: 2, kind: input, shape index: {}]   ;;  %s2845_s3 = inlined_call_operand.vmem [shape: f32[32,16], index: 3, kind: input, shape index: {}]   ;;  %s2846_s4 = inlined_call_operand.vmem [shape: f32[1,8,128], index: 4, kind: output, shape index: {}]  }
   0x1   :  { %v40_v0 = vld [vmem:[%s2842_s1] sm:$0xff]  ;;  %v41_v1 = vld [vmem:[%s2842_s1 + $0x8] sm:$0xff]  ;;  %v42_v2 = vld [vmem:[%s2842_s1 + $0x10] sm:$0xff] }
   0x2   :  { %v57_v3 = vand.u32 4294901760, %v40_v0  ;;  %v60_v4 = vand.u32 4294901760, %v41_v1  ;;  %v43_v5 = vld [vmem:[%s2842_s1 + $0x18] sm:$0xff]  ;;  %v63_v6 = vand.u32 4294901760, %v42_v2  ;;  %v17_v7 = vld [vmem:[%s2843_s0] sm:$0xff]  ;;  %v18_v8 = vld [vmem:[%s2843_s0 + $0x8] sm:$0xff] }
   0x3   :  { %v66_v9 = vand.u32 4294901760, %v43_v5  ;;  %v19_v10 = vld [vmem:[%s2843_s0 + $0x10] sm:$0xff]  ;;  %v20_v11 = vld [vmem:[%s2843_s0 + $0x18] sm:$0xff]  ;;  %v22_v12 = vsel %vm21_vm0, %v17_v7, 0.0  ;;  %v23_v13 = vsel %vm21_vm0, %v18_v8, 0.0 }
   0x4   :  { %v2663_v14 = vpack.c.bf16 %v60_v4, %v57_v3  ;;  %v24_v15 = vadd.f32 %v23_v13, %v22_v12  ;;  %v25_v16 = vsel %vm21_vm0, %v19_v10, 0.0  ;;  %v27_v18 = vsel %vm21_vm0, %v20_v11, 0.0 }
   0x5   :  { %v2666_v17 = vpack.c.bf16 %v66_v9, %v63_v6  ;;  %v2669_v19 = vsub.f32 %v40_v0, %v57_v3  ;;  %v2671_v20 = vsub.f32 %v41_v1, %v60_v4  ;;  %v181_v36 = vsub.f32 %v42_v2, %v63_v6 }
   0x6   :  { %2425 = vmatprep.subr.bf16.mxu0 %v2663_v14  ;;  %2401 = vmatprep.subr.bf16.mxu1 %v2663_v14  ;;  %v26_v21 = vadd.f32 %v25_v16, %v24_v15  ;;  %v188_v37 = vsub.f32 %v43_v5, %v66_v9  ;;  %v675_v15 = vld [vmem:[%s2844_s2 + $0x8] sm:$0xff] }
   0x7   :  { %2427 = vmatpush3.bf16.msra.mxu0 %v2663_v14  ;;  %2403 = vmatpush3.bf16.msra.mxu1 %v2663_v14  ;;  %v168_v22 = vand.u32 4294901760, %v2669_v19  ;;  %v175_v23 = vand.u32 4294901760, %v2671_v20  ;;  %v182_v40 = vand.u32 4294901760, %v181_v36  ;;  %v2416_v12 = vpack.c.bf16 %v2671_v20, %v2669_v19 }
   0x8   :  { %2429 = vmatprep.subr.bf16.mxu0 %v2666_v17  ;;  %2405 = vmatprep.subr.bf16.mxu1 %v2666_v17  ;;  %v28_v24 = vadd.f32 %v27_v18, %v26_v21  ;;  %v189_v41 = vand.u32 4294901760, %v188_v37  ;;  %v2420_v13 = vpack.c.bf16 %v188_v37, %v181_v36  ;;  %v676_v21 = vld [vmem:[%s2844_s2 + $0x10] sm:$0xff] }
   0x9   :  { %v2432_v25 = vpack.c.bf16 %v175_v23, %v168_v22  ;;  %v169_v26 = vsub.f32 %v2669_v19, %v168_v22  ;;  %v176_v27 = vsub.f32 %v2671_v20, %v175_v23  ;;  %v183_v54 = vsub.f32 %v181_v36, %v182_v40  ;;  %v677_v22 = vld [vmem:[%s2844_s2 + $0x18] sm:$0xff] }
   0xa   :  { %v29_v28 = vrot.slane %v28_v24, 4  ;;  %v190_v55 = vsub.f32 %v188_v37, %v189_v41  ;;  %v2436_v0 = vpack.c.bf16 %v189_v41, %v182_v40  ;;  %v697_v23 = vand.u32 4294901760, %v676_v21 }
   0xb   :  { %2431 = vmatpush3.bf16.msra.mxu0 %v2666_v17  ;;  %2407 = vmatpush3.bf16.msra.mxu1 %v2666_v17  ;;  %v170_v29 = vand.u32 4294901760, %v169_v26  ;;  %v177_v30 = vand.u32 4294901760, %v176_v27  ;;  %v184_v1 = vand.u32 4294901760, %v183_v54 }
   0xc   :  { %v30_v31 = vadd.f32 %v29_v28, %v28_v24  ;;  %2433 = vmatprep.subr.bf16.mxu0 %v2432_v25  ;;  %v191_v2 = vand.u32 4294901760, %v190_v55  ;;  %v700_v24 = vand.u32 4294901760, %v677_v22 }
   0xd   :  { %v2408_v32 = vpack.c.bf16 %v177_v30, %v170_v29  ;;  %v815_v30 = vsub.f32 %v676_v21, %v697_v23 }
   0xe   :  { %v31_v33 = vrot.slane %v30_v31, 2  ;;  %v2711_v27 = vpack.c.bf16 %v700_v24, %v697_v23  ;;  %v1316_v23 = vld [vmem:[%s2845_s3] sm:$0xff] }
   0xf   :  { %2409 = vmatprep.subr.bf16.mxu1 %v2408_v32 }
  0x10   :  { %v32_v34 = vadd.f32 %v31_v33, %v30_v31  ;;  %v822_v31 = vsub.f32 %v677_v22, %v700_v24  ;;  %v1317_v24 = vld [vmem:[%s2845_s3 + $0x8] sm:$0xff] }
  0x12   :  { %v33_v35 = vrot.slane %v32_v34, 1 }
  0x14   :  { %v34_v38 = vadd.f32 %v33_v35, %v32_v34  ;;  %v816_v34 = vand.u32 4294901760, %v815_v30  ;;  %v823_v35 = vand.u32 4294901760, %v822_v31 }
  0x16   :  { %v35_v39 = vmul.f32 0.03125, %v34_v38  ;;  %v817_v37 = vsub.f32 %v815_v30, %v816_v34  ;;  %v824_v38 = vsub.f32 %v822_v31, %v823_v35 }
  0x18   :  { %v36_v42 = vsub.f32 %v17_v7, %v35_v39  ;;  %v37_v43 = vsub.f32 %v18_v8, %v35_v39  ;;  %v38_v44 = vsub.f32 %v19_v10, %v35_v39  ;;  %v39_v45 = vsub.f32 %v20_v11, %v35_v39 }
  0x19   :  { %v2412_v10 = vpack.c.bf16 %v191_v2, %v184_v1  ;;  %v818_v39 = vand.u32 4294901760, %v817_v37  ;;  %v825_v40 = vand.u32 4294901760, %v824_v38 }
  0x1a   :  { %v45_v46 = vsel %vm21_vm0, %v36_v42, 0  ;;  %v48_v47 = vsel %vm21_vm0, %v37_v43, 0  ;;  %v51_v48 = vsel %vm21_vm0, %v38_v44, 0  ;;  %v54_v49 = vsel %vm21_vm0, %v39_v45, 0 }
  0x1b   :  { %v125_v50 = vand.u32 4294901760, %v45_v46  ;;  %v135_v51 = vand.u32 4294901760, %v48_v47  ;;  %v145_v52 = vand.u32 4294901760, %v51_v48  ;;  %v155_v53 = vand.u32 4294901760, %v54_v49 }
  0x1c   :  { %v2460_v41 = vpack.c.bf16 %v825_v40, %v818_v39  ;;  %v2468_v43 = vpack.c.bf16 %v822_v31, %v815_v30  ;;  %v2717_v45 = vpack.c.bf16 %v823_v35, %v816_v34  ;;  %v1319_v30 = vld [vmem:[%s2845_s3 + $0x18] sm:$0xff] }
  0x1d   :  { %v126_v56 = vsub.f32 %v45_v46, %v125_v50  ;;  %v136_v57 = vsub.f32 %v48_v47, %v135_v51  ;;  %v146_v58 = vsub.f32 %v51_v48, %v145_v52  ;;  %v156_v59 = vsub.f32 %v54_v49, %v155_v53 }
  0x1f   :  { %v127_v60 = vand.u32 4294901760, %v126_v56  ;;  %v137_v61 = vand.u32 4294901760, %v136_v57  ;;  %v147_v62 = vand.u32 4294901760, %v146_v58  ;;  %v157_v63 = vand.u32 4294901760, %v156_v59 }
  0x21   :  { %2198 = vmatprep.mubr.f32.mxu0 %v127_v60  ;;  %v128_v3 = vsub.f32 %v126_v56, %v127_v60  ;;  %v138_v4 = vsub.f32 %v136_v57, %v137_v61  ;;  %v148_v5 = vsub.f32 %v146_v58, %v147_v62  ;;  %v158_v6 = vsub.f32 %v156_v59, %v157_v63 }
  0x22   :  { %2199 = vmatmul.mubr.f32.vlgmr.msra.gmra.mrb[0].mxu0 %v137_v61 }
  0x23   :  { %2435 = vmatpush3.bf16.msra.mxu0 %v2432_v25  ;;  %v129_v7 = vand.u32 4294901760, %v128_v3  ;;  %2201 = vmatprep.mubr.f32.mxu0 %v147_v62  ;;  %v139_v8 = vand.u32 4294901760, %v138_v4  ;;  %v149_v9 = vand.u32 4294901760, %v148_v5  ;;  %v159_v11 = vand.u32 4294901760, %v158_v6 }
  0x24   :  { %2437 = vmatprep.subr.bf16.mxu0 %v2436_v0 }
  0x25   :  { %2156 = vmatprep.mubr.f32.mxu1 %v129_v7 }
  0x26   :  { %2157 = vmatmul.mubr.f32.vlgmr.msra.gmra.mrb[0].mxu1 %v139_v8  ;;  %2202 = vmatmul.mubr.f32.gmra.mrb[2].mxu0 %v157_v63 }
  0x27   :  { %2411 = vmatpush3.bf16.msra.mxu1 %v2408_v32  ;;  %2439 = vmatpush3.bf16.msra.mxu0 %v2436_v0 }
  0x28   :  { %2159 = vmatprep.mubr.f32.mxu1 %v149_v9  ;;  %2413 = vmatprep.subr.bf16.mxu1 %v2412_v10 }
  0x29   :  { %2212 = vmatprep.mubr.f32.mxu0 %v125_v50  ;;  %2441 = vmatprep.subr.bf16.mxu0 %v2663_v14 }
  0x2a   :  { %2160 = vmatmul.mubr.f32.gmra.mrb[2].mxu1 %v159_v11  ;;  %2213 = vmatmul.mubr.f32.vlgmr.msra.gmra.mrb[0].mxu0 %v135_v51 }
  0x2b   :  { %2415 = vmatpush3.bf16.msra.mxu1 %v2412_v10  ;;  %2443 = vmatpush3.bf16.msra.mxu0 %v2663_v14  ;;  %v674_v14 = vld [vmem:[%s2844_s2] sm:$0xff] }
  0x2c   :  { %2170 = vmatprep.mubr.f32.mxu1 %v125_v50  ;;  %2417 = vmatprep.subr.bf16.mxu1 %v2416_v12  ;;  %v691_v16 = vand.u32 4294901760, %v674_v14 }
  0x2d   :  { %2215 = vmatprep.mubr.f32.mxu0 %v145_v52  ;;  %2445 = vmatprep.subr.bf16.mxu0 %v2666_v17 }
  0x2e   :  { %2171 = vmatmul.mubr.f32.vlgmr.msra.gmra.mrb[0].mxu1 %v135_v51  ;;  %2216 = vmatmul.mubr.f32.gmra.mrb[2].mxu0 %v155_v53  ;;  %v801_v19 = vsub.f32 %v674_v14, %v691_v16 }
  0x2f   :  { %2419 = vmatpush3.bf16.msra.mxu1 %v2416_v12  ;;  %2447 = vmatpush3.bf16.msra.mxu0 %v2666_v17  ;;  %v694_v17 = vand.u32 4294901760, %v675_v15 }
  0x30   :  { %2173 = vmatprep.mubr.f32.mxu1 %v145_v52  ;;  %2421 = vmatprep.subr.bf16.mxu1 %v2420_v13  ;;  %v802_v25 = vand.u32 4294901760, %v801_v19 }
  0x31   :  { %2226 = vmatprep.mubr.f32.mxu0 %v125_v50  ;;  %v2701_v18 = vpack.c.bf16 %v694_v17, %v691_v16  ;;  %v808_v20 = vsub.f32 %v675_v15, %v694_v17 }
  0x32   :  { %2174 = vmatmul.mubr.f32.gmra.mrb[2].mxu1 %v155_v53  ;;  %2227 = vmatmul.mubr.f32.vlgmr.msra.gmra.mrb[0].mxu0 %v135_v51  ;;  %v803_v28 = vsub.f32 %v801_v19, %v802_v25 }
  0x33   :  { %2423 = vmatpush3.bf16.msra.mxu1 %v2420_v13  ;;  %2184 = vmatprep.mubr.f32.mxu1 %v126_v56  ;;  %v809_v26 = vand.u32 4294901760, %v808_v20  ;;  %v2464_v42 = vpack.c.bf16 %v808_v20, %v801_v19 }
  0x34   :  { %2229 = vmatprep.mubr.f32.mxu0 %v145_v52  ;;  %2449 = vmatprep.subr.bf16.mxu1 %v2701_v18  ;;  %v804_v32 = vand.u32 4294901760, %v803_v28 }
  0x35   :  { %v810_v29 = vsub.f32 %v808_v20, %v809_v26  ;;  %v2715_v44 = vpack.c.bf16 %v809_v26, %v802_v25  ;;  %v1336_v25 = vand.u32 4294901760, %v1317_v24 }
  0x36   :  { %2185 = vmatmul.mubr.f32.vlgmr.msra.gmra.mrb[0].mxu1 %v136_v57  ;;  %2230 = vmatmul.mubr.f32.gmra.mrb[2].mxu0 %v155_v53 }
  0x37   :  { %2187 = vmatprep.mubr.f32.mxu1 %v146_v58  ;;  %2451 = vmatpush3.bf16.msra.mxu1 %v2701_v18  ;;  %v811_v33 = vand.u32 4294901760, %v810_v29  ;;  %v1450_v29 = vsub.f32 %v1317_v24, %v1336_v25 }
  0x38   :  { %2453 = vmatprep.subr.bf16.mxu1 %v2711_v27 }
  0x39   :  { %v2456_v36 = vpack.c.bf16 %v811_v33, %v804_v32  ;;  %v1342_v32 = vand.u32 4294901760, %v1319_v30  ;;  %v1451_v34 = vand.u32 4294901760, %v1450_v29 }
  0x3a   :  { %2188 = vmatmul.mubr.f32.gmra.mrb[2].mxu1 %v156_v59 }
  0x3b   :  { %2455 = vmatpush3.bf16.msra.mxu1 %v2711_v27  ;;  %v1452_v37 = vsub.f32 %v1450_v29, %v1451_v34  ;;  %v1464_v39 = vsub.f32 %v1319_v30, %v1342_v32 }
  0x3c   :  { %2457 = vmatprep.subr.bf16.mxu1 %v2456_v36 }
 0x105   :  { %v2228_v46 = vpop.f32.mrb[0].mxu0 }
 0x106   :  { %v648_v47 = vpop.f32.mrb[1].mxu0 }
 0x109   :  { %v2186_v48 = vpop.f32.mrb[0].mxu1  ;;  %v2231_v49 = vpop.f32.mrb[2].mxu0 }
 0x10a   :  { %v2719_v50 = vadd.f32 %v2228_v46, %v2186_v48  ;;  %v350_v51 = vpop.f32.mrb[1].mxu1  ;;  %v660_v52 = vpop.f32.mrb[3].mxu0 }
 0x10b   :  { %v2721_v53 = vadd.f32 %v648_v47, %v350_v51 }
 0x10c   :  { %v671_v54 = vmul.f32 %v2719_v50, %v2719_v50 }
 0x10d   :  { %v670_v55 = vmul.f32 %v2721_v53, %v2721_v53  ;;  %v2189_v56 = vpop.f32.mrb[2].mxu1 }
 0x10e   :  { %v682_v57 = vsel %vm21_vm0, %v671_v54, 0  ;;  %v2728_v58 = vadd.f32 %v2231_v49, %v2189_v56  ;;  %v364_v59 = vpop.f32.mrb[3].mxu1 }
 0x10f   :  { %v2730_v60 = vand.u32 4294901760, %v682_v57  ;;  %v679_v61 = vsel %vm21_vm0, %v670_v55, 0  ;;  %v2733_v62 = vadd.f32 %v660_v52, %v364_v59 }
 0x110   :  { %v759_v63 = vand.u32 4294901760, %v679_v61  ;;  %v673_v0 = vmul.f32 %v2728_v58, %v2728_v58 }
 0x111   :  { %v770_v1 = vsub.f32 %v682_v57, %v2730_v60  ;;  %v672_v2 = vmul.f32 %v2733_v62, %v2733_v62 }
 0x112   :  { %v760_v3 = vsub.f32 %v679_v61, %v759_v63  ;;  %v688_v4 = vsel %vm21_vm0, %v673_v0, 0 }
 0x113   :  { %v771_v5 = vand.u32 4294901760, %v770_v1  ;;  %v789_v6 = vand.u32 4294901760, %v688_v4  ;;  %v685_v7 = vsel %vm21_vm0, %v672_v2, 0 }
 0x114   :  { %v779_v8 = vand.u32 4294901760, %v685_v7  ;;  %v761_v9 = vand.u32 4294901760, %v760_v3 }
 0x115   :  { %v772_v10 = vsub.f32 %v770_v1, %v771_v5  ;;  %v790_v11 = vsub.f32 %v688_v4, %v789_v6 }
 0x116   :  { %v780_v12 = vsub.f32 %v685_v7, %v779_v8  ;;  %v762_v13 = vsub.f32 %v760_v3, %v761_v9 }
 0x117   :  { %v791_v14 = vand.u32 4294901760, %v790_v11  ;;  %v773_v17 = vand.u32 4294901760, %v772_v10 }
 0x118   :  { %v763_v15 = vand.u32 4294901760, %v762_v13  ;;  %v781_v16 = vand.u32 4294901760, %v780_v12 }
 0x119   :  { %v792_v19 = vsub.f32 %v790_v11, %v791_v14 }
 0x11a   :  { %2240 = vmatprep.mubr.f32.mxu1 %v763_v15  ;;  %v782_v20 = vsub.f32 %v780_v12, %v781_v16 }
 0x11b   :  { %2241 = vmatmul.mubr.f32.vlgmr.msra.gmra.mrb[4].mxu1 %v773_v17  ;;  %v793_v22 = vand.u32 4294901760, %v792_v19 }
 0x11c   :  { %2459 = vmatpush3.bf16.msra.mxu1 %v2456_v36  ;;  %v783_v21 = vand.u32 4294901760, %v782_v20 }
 0x11d   :  { %2461 = vmatprep.subr.bf16.mxu1 %v2460_v41 }
 0x11e   :  { %2243 = vmatprep.mubr.f32.mxu1 %v783_v21 }
 0x11f   :  { %2244 = vmatmul.mubr.f32.gmra.mrb[6].mxu1 %v793_v22 }
 0x120   :  { %2463 = vmatpush3.bf16.msra.mxu1 %v2460_v41  ;;  %2254 = vmatprep.mubr.f32.mxu1 %v759_v63  ;;  %v1453_v41 = vand.u32 4294901760, %v1452_v37 }
 0x121   :  { %2465 = vmatprep.subr.bf16.mxu1 %v2464_v42 }
 0x123   :  { %2255 = vmatmul.mubr.f32.vlgmr.msra.gmra.mrb[4].mxu1 %v2730_v60 }
 0x124   :  { %2467 = vmatpush3.bf16.msra.mxu1 %v2464_v42  ;;  %2257 = vmatprep.mubr.f32.mxu1 %v779_v8 }
 0x125   :  { %2469 = vmatprep.subr.bf16.mxu1 %v2468_v43 }
 0x127   :  { %2258 = vmatmul.mubr.f32.gmra.mrb[6].mxu1 %v789_v6 }
 0x128   :  { %2471 = vmatpush3.bf16.msra.mxu1 %v2468_v43  ;;  %2268 = vmatprep.mubr.f32.mxu1 %v760_v3  ;;  %v1465_v43 = vand.u32 4294901760, %v1464_v39 }
 0x129   :  { %2473 = vmatprep.subr.bf16.mxu1 %v2701_v18 }
 0x12a   :  { %v1466_v46 = vsub.f32 %v1464_v39, %v1465_v43 }
 0x12b   :  { %2269 = vmatmul.mubr.f32.vlgmr.msra.gmra.mrb[4].mxu1 %v770_v1 }
 0x12c   :  { %2475 = vmatpush3.bf16.msra.mxu1 %v2701_v18  ;;  %2271 = vmatprep.mubr.f32.mxu1 %v780_v12  ;;  %v1467_v48 = vand.u32 4294901760, %v1466_v46 }
 0x12d   :  { %2477 = vmatprep.subr.bf16.mxu1 %v2711_v27 }
 0x12f   :  { %2272 = vmatmul.mubr.f32.gmra.mrb[6].mxu1 %v790_v11 }
 0x130   :  { %2479 = vmatpush3.bf16.msra.mxu1 %v2711_v27  ;;  %2282 = vmatprep.mubr.f32.mxu1 %v761_v9 }
 0x131   :  { %2481 = vmatprep.subr.bf16.mxu1 %v2715_v44 }
 0x133   :  { %2283 = vmatmul.mubr.f32.vlgmr.msra.gmra.mrb[4].mxu1 %v771_v5 }
 0x134   :  { %2483 = vmatpush3.bf16.msra.mxu1 %v2715_v44  ;;  %2285 = vmatprep.mubr.f32.mxu1 %v781_v16 }
 0x135   :  { %2485 = vmatprep.subr.bf16.mxu1 %v2717_v45 }
 0x137   :  { %2286 = vmatmul.mubr.f32.gmra.mrb[6].mxu1 %v791_v14 }
 0x138   :  { %2487 = vmatpush3.bf16.msra.mxu1 %v2717_v45  ;;  %2296 = vmatprep.mubr.f32.mxu1 %v759_v63 }
 0x139   :  { %2489 = vmatprep.subr.bf16.mxu1 %v2701_v18 }
 0x13b   :  { %2297 = vmatmul.mubr.f32.vlgmr.msra.gmra.mrb[4].mxu1 %v2730_v60 }
 0x13c   :  { %2491 = vmatpush3.bf16.msra.mxu1 %v2701_v18  ;;  %2299 = vmatprep.mubr.f32.mxu1 %v779_v8  ;;  %v1333_v18 = vand.u32 4294901760, %v1316_v23 }
 0x13d   :  { %2493 = vmatprep.subr.bf16.mxu1 %v2711_v27 }
 0x13e   :  { %v2763_v26 = vpack.c.bf16 %v1336_v25, %v1333_v18  ;;  %v1443_v28 = vsub.f32 %v1316_v23, %v1333_v18 }
 0x13f   :  { %2300 = vmatmul.mubr.f32.gmra.mrb[6].mxu1 %v789_v6 }
 0x140   :  { %2495 = vmatpush3.bf16.msra.mxu1 %v2711_v27  ;;  %2310 = vmatprep.mubr.f32.mxu1 %v759_v63  ;;  %v1318_v27 = vld [vmem:[%s2845_s3 + $0x10] sm:$0xff]  ;;  %v1444_v33 = vand.u32 4294901760, %v1443_v28  ;;  %v2782_v51 = vpack.c.bf16 %v1450_v29, %v1443_v28 }
 0x141   :  { %2497 = vmatprep.subr.bf16.mxu0 %v2763_v26  ;;  %v1339_v31 = vand.u32 4294901760, %v1318_v27 }
 0x142   :  { %2499 = vmatpush3.bf16.msra.mxu0 %v2763_v26  ;;  %v1445_v36 = vsub.f32 %v1443_v28, %v1444_v33  ;;  %v2786_v54 = vpack.c.bf16 %v1451_v34, %v1444_v33 }
 0x143   :  { %2311 = vmatmul.mubr.f32.vlgmr.msra.gmra.mrb[4].mxu1 %v2730_v60  ;;  %v2773_v35 = vpack.c.bf16 %v1342_v32, %v1339_v31  ;;  %v1457_v38 = vsub.f32 %v1318_v27, %v1339_v31 }
 0x144   :  { %2313 = vmatprep.mubr.f32.mxu1 %v779_v8  ;;  %v1446_v40 = vand.u32 4294901760, %v1445_v36 }
 0x145   :  { %2501 = vmatprep.subr.bf16.mxu0 %v2773_v35  ;;  %v1458_v42 = vand.u32 4294901760, %v1457_v38  ;;  %v2784_v52 = vpack.c.bf16 %v1464_v39, %v1457_v38 }
 0x146   :  { %2503 = vmatpush3.bf16.msra.mxu0 %v2773_v35  ;;  %v2777_v44 = vpack.c.bf16 %v1453_v41, %v1446_v40 }
 0x147   :  { %2314 = vmatmul.mubr.f32.gmra.mrb[6].mxu1 %v789_v6  ;;  %v1459_v45 = vsub.f32 %v1457_v38, %v1458_v42  ;;  %v2788_v55 = vpack.c.bf16 %v1465_v43, %v1458_v42 }
 0x148   :  { %2505 = vmatprep.subr.bf16.mxu0 %v2777_v44 }
 0x149   :  { %v1460_v47 = vand.u32 4294901760, %v1459_v45 }
 0x14b   :  { %v2780_v49 = vpack.c.bf16 %v1467_v48, %v1460_v47 }
 0x216   :  { %v2312_v56 = vpop.f32.mrb[4].mxu1 }
 0x217   :  { %v1305_v57 = vmax.f32 %v2312_v56, 1e-24  ;;  %v1282_v59 = vpop.f32.mrb[5].mxu1 }
 0x218   :  { %v1304_v60 = vmax.f32 %v1282_v59, 1e-24 }
 0x219   :  { %2604 = vrsqrt.f32 %v1305_v57 }
 0x21a   :  { %2606 = vrsqrt.f32 %v1304_v60  ;;  %v2315_v61 = vpop.f32.mrb[6].mxu1 }
 0x21b   :  { %v1307_v63 = vmax.f32 %v2315_v61, 1e-24  ;;  %v1294_v0 = vpop.f32.mrb[7].mxu1 }
 0x21c   :  { %v1306_v1 = vmax.f32 %v1294_v0, 1e-24 }
 0x21d   :  { %2608 = vrsqrt.f32 %v1307_v63 }
 0x21e   :  { %2610 = vrsqrt.f32 %v1306_v1 }
 0x223   :  { %v2605_v2 = vpop.eup %2604 }
 0x224   :  { %v2607_v3 = vpop.eup %2606  ;;  %v1313_v4 = vmul.f32 %v2605_v2, %v2719_v50 }
 0x225   :  { %v1312_v5 = vmul.f32 %v2607_v3, %v2721_v53 }
 0x226   :  { %v1973_v6 = vmul.f32 %v1313_v4, %v1313_v4  ;;  %v1324_v7 = vsel %vm21_vm0, %v1313_v4, 0 }
 0x227   :  { %v2609_v8 = vpop.eup %2608  ;;  %v2793_v9 = vand.u32 4294901760, %v1324_v7  ;;  %v1321_v10 = vsel %vm21_vm0, %v1312_v5, 0  ;;  %v1972_v13 = vmul.f32 %v1312_v5, %v1312_v5 }
 0x228   :  { %v2611_v11 = vpop.eup %2610  ;;  %v1979_v12 = vsel %vm21_vm0, %v1973_v6, 0.0  ;;  %v2797_v14 = vand.u32 4294901760, %v1321_v10  ;;  %v1315_v15 = vmul.f32 %v2609_v8, %v2728_v58 }
 0x229   :  { %1980 = vadd.xlane.f32.xlu1 %v1979_v12  ;;  %v1412_v50 = vsub.f32 %v1324_v7, %v2793_v9  ;;  %v1314_v53 = vmul.f32 %v2611_v11, %v2733_v62  ;;  %v1976_v22 = vsel %vm21_vm0, %v1972_v13, 0.0 }
 0x22a   :  { %v1402_v16 = vsub.f32 %v1321_v10, %v2797_v14  ;;  %v1330_v17 = vsel %vm21_vm0, %v1315_v15, 0  ;;  %v1975_v31 = vmul.f32 %v1315_v15, %v1315_v15 }
 0x22b   :  { %v1413_v19 = vand.u32 4294901760, %v1412_v50  ;;  %v1327_v20 = vsel %vm21_vm0, %v1314_v53, 0  ;;  %v2805_v21 = vand.u32 4294901760, %v1330_v17  ;;  %v1974_v23 = vmul.f32 %v1314_v53, %v1314_v53 }
 0x22c   :  { %v1421_v24 = vand.u32 4294901760, %v1327_v20  ;;  %v1403_v18 = vand.u32 4294901760, %v1402_v16  ;;  %v1985_v37 = vsel %vm21_vm0, %v1975_v31, 0.0 }
 0x22d   :  { %v1414_v58 = vsub.f32 %v1412_v50, %v1413_v19  ;;  %1977 = vadd.xlane.f32.xlu1 %v1976_v22  ;;  %v1432_v25 = vsub.f32 %v1330_v17, %v2805_v21  ;;  %v1982_v27 = vsel %vm21_vm0, %v1974_v23, 0.0 }
 0x22e   :  { %v1422_v28 = vsub.f32 %v1327_v20, %v1421_v24  ;;  %v1404_v62 = vsub.f32 %v1402_v16, %v1403_v18 }
 0x22f   :  { %v1433_v29 = vand.u32 4294901760, %v1432_v25  ;;  %v1415_v33 = vand.u32 4294901760, %v1414_v58 }
 0x230   :  { %v1405_v30 = vand.u32 4294901760, %v1404_v62  ;;  %v1423_v32 = vand.u32 4294901760, %v1422_v28 }
 0x231   :  { %1983 = vadd.xlane.f32.xlu1 %v1982_v27  ;;  %v1434_v34 = vsub.f32 %v1432_v25, %v1433_v29 }
 0x232   :  { %2324 = vmatprep.mubr.f32.mxu0 %v1405_v30  ;;  %v1424_v36 = vsub.f32 %v1422_v28, %v1423_v32 }
 0x233   :  { %2325 = vmatmul.mubr.f32.vlgmr.msra.gmra.mrb[4].mxu0 %v1415_v33  ;;  %v1435_v39 = vand.u32 4294901760, %v1434_v34 }
 0x234   :  { %2507 = vmatpush3.bf16.msra.mxu0 %v2777_v44  ;;  %v1425_v38 = vand.u32 4294901760, %v1424_v36 }
 0x235   :  { %1986 = vadd.xlane.f32.xlu1 %v1985_v37  ;;  %2509 = vmatprep.subr.bf16.mxu0 %v2780_v49 }
 0x236   :  { %2327 = vmatprep.mubr.f32.mxu0 %v1425_v38 }
 0x237   :  { %2328 = vmatmul.mubr.f32.gmra.mrb[6].mxu0 %v1435_v39 }
 0x238   :  { %2511 = vmatpush3.bf16.msra.mxu0 %v2780_v49  ;;  %2338 = vmatprep.mubr.f32.mxu0 %v2797_v14 }
 0x239   :  { %2513 = vmatprep.subr.bf16.mxu0 %v2782_v51 }
 0x23b   :  { %2339 = vmatmul.mubr.f32.vlgmr.msra.gmra.mrb[4].mxu0 %v2793_v9 }
 0x23c   :  { %2515 = vmatpush3.bf16.msra.mxu0 %v2782_v51  ;;  %2341 = vmatprep.mubr.f32.mxu0 %v1421_v24 }
 0x23d   :  { %2517 = vmatprep.subr.bf16.mxu0 %v2784_v52 }
 0x23f   :  { %2342 = vmatmul.mubr.f32.gmra.mrb[6].mxu0 %v2805_v21 }
 0x240   :  { %2519 = vmatpush3.bf16.msra.mxu0 %v2784_v52  ;;  %2352 = vmatprep.mubr.f32.mxu0 %v1402_v16 }
 0x241   :  { %2521 = vmatprep.subr.bf16.mxu0 %v2763_v26 }
 0x243   :  { %2353 = vmatmul.mubr.f32.vlgmr.msra.gmra.mrb[4].mxu0 %v1412_v50 }
 0x244   :  { %2523 = vmatpush3.bf16.msra.mxu0 %v2763_v26  ;;  %2355 = vmatprep.mubr.f32.mxu0 %v1422_v28 }
 0x245   :  { %2525 = vmatprep.subr.bf16.mxu0 %v2773_v35 }
 0x247   :  { %2356 = vmatmul.mubr.f32.gmra.mrb[6].mxu0 %v1432_v25 }
 0x248   :  { %2527 = vmatpush3.bf16.msra.mxu0 %v2773_v35  ;;  %2366 = vmatprep.mubr.f32.mxu0 %v1403_v18 }
 0x249   :  { %2529 = vmatprep.subr.bf16.mxu0 %v2786_v54 }
 0x24b   :  { %2367 = vmatmul.mubr.f32.vlgmr.msra.gmra.mrb[4].mxu0 %v1413_v19 }
 0x24c   :  { %2531 = vmatpush3.bf16.msra.mxu0 %v2786_v54  ;;  %2369 = vmatprep.mubr.f32.mxu0 %v1423_v32 }
 0x24d   :  { %2533 = vmatprep.subr.bf16.mxu0 %v2788_v55 }
 0x24f   :  { %2370 = vmatmul.mubr.f32.gmra.mrb[6].mxu0 %v1433_v29 }
 0x250   :  { %2535 = vmatpush3.bf16.msra.mxu0 %v2788_v55  ;;  %2380 = vmatprep.mubr.f32.mxu0 %v2797_v14 }
 0x251   :  { %2537 = vmatprep.subr.bf16.mxu0 %v2763_v26 }
 0x253   :  { %2381 = vmatmul.mubr.f32.vlgmr.msra.gmra.mrb[4].mxu0 %v2793_v9 }
 0x254   :  { %2539 = vmatpush3.bf16.msra.mxu0 %v2763_v26  ;;  %2383 = vmatprep.mubr.f32.mxu0 %v1421_v24 }
 0x255   :  { %2541 = vmatprep.subr.bf16.mxu0 %v2773_v35 }
 0x257   :  { %2384 = vmatmul.mubr.f32.gmra.mrb[6].mxu0 %v2805_v21 }
 0x258   :  { %2543 = vmatpush3.bf16.msra.mxu0 %v2773_v35  ;;  %2394 = vmatprep.mubr.f32.mxu0 %v2797_v14 }
 0x25b   :  { %2395 = vmatmul.mubr.f32.vlgmr.msra.gmra.mrb[4].mxu0 %v2793_v9 }
 0x25c   :  { %2397 = vmatprep.mubr.f32.mxu0 %v1421_v24 }
 0x25f   :  { %2398 = vmatmul.mubr.f32.gmra.mrb[6].mxu0 %v2805_v21 }
 0x2b6   :  { %v1981_v51 = vpop.xlane.xlu1 %1980 }
 0x2ba   :  { %v1978_v52 = vpop.xlane.xlu1 %1977 }
 0x2bb   :  { %v1988_v55 = vadd.f32 %v1981_v51, %v1978_v52 }
 0x2be   :  { %v1984_v54 = vpop.xlane.xlu1 %1983 }
 0x2bf   :  { %v1989_v57 = vadd.f32 %v1988_v55, %v1984_v54 }
 0x2c2   :  { %v1987_v56 = vpop.xlane.xlu1 %1986 }
 0x2c3   :  { %v1990_v60 = vadd.f32 %v1989_v57, %v1987_v56 }
 0x2c5   :  { %v1991_v63 = vrot.slane %v1990_v60, 4 }
 0x2c7   :  { %v1992_v1 = vadd.f32 %v1991_v63, %v1990_v60 }
 0x2c9   :  { %v1993_v5 = vrot.slane %v1992_v1, 2 }
 0x2cb   :  { %v1994_v8 = vadd.f32 %v1993_v5, %v1992_v1 }
 0x2cd   :  { %v1995_v11 = vrot.slane %v1994_v8, 1 }
 0x2cf   :  { %v1996_v14 = vadd.f32 %v1995_v11, %v1994_v8 }
 0x32e   :  { %v2396_v40 = vpop.f32.mrb[4].mxu0 }
 0x32f   :  { %v1947_v41 = vmul.f32 %v2396_v40, %v2396_v40  ;;  %v1924_v42 = vpop.f32.mrb[5].mxu0 }
 0x330   :  { %v1946_v43 = vmul.f32 %v1924_v42, %v1924_v42 }
 0x331   :  { %v1954_v26 = vsel %vm1950_vm1, %v1947_v41, 0.0 }
 0x332   :  { %1955 = vadd.xlane.f32.xlu0 %v1954_v26  ;;  %v2399_v44 = vpop.f32.mrb[6].mxu0  ;;  %v1951_v47 = vsel %vm1950_vm1, %v1946_v43, 0.0 }
 0x333   :  { %v1936_v45 = vpop.f32.mrb[7].mxu0  ;;  %v1949_v35 = vmul.f32 %v2399_v44, %v2399_v44 }
 0x334   :  { %v1948_v46 = vmul.f32 %v1936_v45, %v1936_v45 }
 0x335   :  { %v1960_v49 = vsel %vm1950_vm1, %v1949_v35, 0.0 }
 0x336   :  { %1952 = vadd.xlane.f32.xlu0 %v1951_v47  ;;  %v1957_v48 = vsel %vm1950_vm1, %v1948_v46, 0.0 }
 0x33a   :  { %1958 = vadd.xlane.f32.xlu0 %v1957_v48 }
 0x33e   :  { %1961 = vadd.xlane.f32.xlu0 %v1960_v49 }
 0x3bf   :  { %v1956_v59 = vpop.xlane.xlu0 %1955 }
 0x3c3   :  { %v1953_v61 = vpop.xlane.xlu0 %1952 }
 0x3c4   :  { %v1963_v2 = vadd.f32 %v1956_v59, %v1953_v61 }
 0x3c7   :  { %v1959_v0 = vpop.xlane.xlu0 %1958 }
 0x3c8   :  { %v1964_v3 = vadd.f32 %v1963_v2, %v1959_v0 }
 0x3cb   :  { %v1962_v4 = vpop.xlane.xlu0 %1961 }
 0x3cc   :  { %v1965_v6 = vadd.f32 %v1964_v3, %v1962_v4 }
 0x3ce   :  { %v1966_v7 = vrot.slane %v1965_v6, 4 }
 0x3d0   :  { %v1967_v9 = vadd.f32 %v1966_v7, %v1965_v6 }
 0x3d2   :  { %v1968_v10 = vrot.slane %v1967_v9, 2 }
 0x3d4   :  { %v1969_v12 = vadd.f32 %v1968_v10, %v1967_v9 }
 0x3d6   :  { %v1970_v13 = vrot.slane %v1969_v12, 1 }
 0x3d8   :  { %v1971_v15 = vadd.f32 %v1970_v13, %v1969_v12 }
 0x3da   :  { %v1997_v50 = vsub.f32 %v1971_v15, %v1996_v14 }
 0x3dc   :  { %v1998_v53 = vmul.f32 0.5, %v1997_v50 }
 0x3de   :  { %1999 = vst [vmem:[%s2846_s4] sm:$0xff] %v1998_v53 }

</bundles_post_ra>
